<compile_context>
chip_gen: v5e
topology: v5e:2x2
jax: 0.10.0
libtpu: 0.0.40
codegen_flags: <defaults>
</compile_context>

<pallas_src>
import functools
import math

import jax
import jax.numpy as jnp
import numpy as np
from jax import lax
from jax.experimental import pallas as pl
from jax.experimental.pallas import tpu as pltpu


# ----------------------------------------------------------------------------
# Kernel: one grid step per batch element; everything for that batch in VMEM.
# ----------------------------------------------------------------------------
def cross_attn_kernel(q_ref, kv_ref, wq_ref, bq_ref, wkv_ref, bkv_ref, wo_ref,
                      vec_ref, o_ref, *, num_heads, mxu_dtype, approx_recip):
    _, Lq, E = q_ref.shape
    Lkv = kv_ref.shape[1]
    H = num_heads
    Dh = E // H

    xq = q_ref[0]            # (Lq, E)  f32 (residual / LayerNorm path stays f32)
    xkv = kv_ref[0]          # (Lkv, E) f32
    wq = wq_ref[...]         # (E, E)   mxu_dtype, 1/sqrt(Dh) pre-folded
    wkv = wkv_ref[...]       # (E, 2E)  mxu_dtype, [Wk^T | Wv^T]
    wo = wo_ref[...]         # (E, E)   mxu_dtype
    bq = bq_ref[...]         # (1, E)   f32, scale pre-folded
    bkv = bkv_ref[...]       # (1, 2E)  f32
    vecs = vec_ref[...]      # (3, E)   f32: out-proj bias, LN gamma, LN beta

    # --- Unbatched lane-dense projections: K = E, N = E / 2E ------------------
    xq_m = xq.astype(mxu_dtype)        # cast once, before any reuse
    xkv_m = xkv.astype(mxu_dtype)
    q2 = jnp.dot(xq_m, wq, preferred_element_type=jnp.float32) + bq       # (Lq, E)
    kv2 = jnp.dot(xkv_m, wkv, preferred_element_type=jnp.float32) + bkv   # (Lkv, 2E)

    q2m = q2.astype(mxu_dtype)                  # cast once for the attention matmuls
    k2m = kv2[:, :E].astype(mxu_dtype)          # (Lkv, E)   static lane slices
    v2m = kv2[:, E:].astype(mxu_dtype)          # (Lkv, E)

    # --- Per-head scaled-dot-product attention (static unroll over H) ---------
    # Lkv is a lane multiple, so scores/softmax run on full vregs; the softmax
    # reciprocal goes to the EUP slot (exact-divide fallback via approx_recip).
    # TODO(synk): key_padding_mask (additive -inf on masked key columns) is not
    #             implemented; only the mask=None path of nn.MultiheadAttention
    #             is covered (dropout is identity in eval mode).
    # TODO(synk): for production sizes (E=768, long Lq/Lkv) tile Lq/Lkv via the
    #             grid with a flash-style online softmax and set
    #             vmem_limit_bytes explicitly (v7x has 64 MiB physical VMEM).
    ctx_parts = []
    for h in range(H):
        lo = h * Dh
        qh = q2m[:, lo:lo + Dh]                                   # (Lq, Dh)
        kh = k2m[:, lo:lo + Dh]                                   # (Lkv, Dh)
        vh = v2m[:, lo:lo + Dh]                                   # (Lkv, Dh)
        s = jnp.einsum("qd,kd->qk", qh, kh,
                       preferred_element_type=jnp.float32)        # (Lq, Lkv) f32
        m = jnp.max(s, axis=-1, keepdims=True)
        p = jnp.exp(s - m)
        denom = jnp.sum(p, axis=-1, keepdims=True)
        attn = p * pl.reciprocal(denom, approx=approx_recip)
        ctx_parts.append(jnp.dot(attn.astype(mxu_dtype), vh,
                                 preferred_element_type=jnp.float32))  # (Lq, Dh)

    # Head merge is pure layout (lane concat); the head-SUM happens inside the
    # single K = H*Dh = E output-projection matmul below (full MXU depth).
    ctx = jnp.concatenate(ctx_parts, axis=-1)                     # (Lq, E) f32

    attn_out = jnp.dot(ctx.astype(mxu_dtype), wo,
                       preferred_element_type=jnp.float32) + vecs[0:1]  # + b_o

    # --- Residual + LayerNorm (eps=1e-5, biased variance), all in f32 ---------
    y = xq + attn_out
    mean = jnp.mean(y, axis=-1, keepdims=True)
    var = jnp.mean(jnp.square(y - mean), axis=-1, keepdims=True)
    y_n = (y - mean) * lax.rsqrt(var + 1e-5)
    o_ref[0] = y_n * vecs[1:2] + vecs[2:3]


# ----------------------------------------------------------------------------
# Wrapper
# ----------------------------------------------------------------------------
def cross_attention(query, key_value, params, *, num_heads,
                    mxu_dtype=jnp.float32, approx_recip=True):
    B, Lq, E = query.shape
    _, Lkv, _ = key_value.shape
    Dh = E // num_heads
    assert Dh * num_heads == E
    scale = 1.0 / math.sqrt(Dh)

    # One-time lane-dense parameter re-layout (genuine parameter prep, not a
    # per-call hot op):
    #   * 1/sqrt(Dh) folded into Wq / bq so the kernel never rescales q,
    #   * [Wk^T | Wv^T] stacked into (E, 2E), biases flattened,
    #   * out-proj bias + LN gamma/beta stacked into one (3, E) tile.
    w_q = (params["wq"].T * scale).astype(mxu_dtype)                     # (E, E)
    b_q = (params["bq"] * scale).reshape(1, E).astype(jnp.float32)       # (1, E)
    w_kv = jnp.concatenate([params["wk"].T, params["wv"].T],
                           axis=1).astype(mxu_dtype)                     # (E, 2E)
    b_kv = jnp.concatenate([params["bk"], params["bv"]]
                           ).reshape(1, 2 * E).astype(jnp.float32)       # (1, 2E)
    w_o = params["wo"].T.astype(mxu_dtype)                               # (E, E)
    vecs = jnp.stack([params["bo"], params["ln_gamma"],
                      params["ln_beta"]]).astype(jnp.float32)            # (3, E)

    kernel = functools.partial(cross_attn_kernel, num_heads=num_heads,
                               mxu_dtype=mxu_dtype, approx_recip=approx_recip)

    return pl.pallas_call(
        kernel,
        out_shape=jax.ShapeDtypeStruct((B, Lq, E), jnp.float32),
        grid=(B,),
        in_specs=[
            pl.BlockSpec((1, Lq, E), lambda b: (b, 0, 0)),     # query
            pl.BlockSpec((1, Lkv, E), lambda b: (b, 0, 0)),    # key_value
            pl.BlockSpec((E, E), lambda b: (0, 0)),            # W_q (scaled)
            pl.BlockSpec((1, E), lambda b: (0, 0)),            # b_q (scaled)
            pl.BlockSpec((E, 2 * E), lambda b: (0, 0)),        # [Wk|Wv]
            pl.BlockSpec((1, 2 * E), lambda b: (0, 0)),        # [bk|bv]
            pl.BlockSpec((E, E), lambda b: (0, 0)),            # W_o
            pl.BlockSpec((3, E), lambda b: (0, 0)),            # b_o, gamma, beta
        ],
        out_specs=pl.BlockSpec((1, Lq, E), lambda b: (b, 0, 0)),
        compiler_params=pltpu.CompilerParams(
            dimension_semantics=("parallel",)),                # both v7x TCs
    )(query.astype(jnp.float32), key_value.astype(jnp.float32),
      w_q, b_q, w_kv, b_kv, w_o, vecs)


# ----------------------------------------------------------------------------
# Pure-JAX reference (mirrors torch.nn.MultiheadAttention eval forward + norm)
# ----------------------------------------------------------------------------
def ref_forward(query, key_value, params, *, num_heads):
    B, Lq, E = query.shape
    Lkv = key_value.shape[1]
    Dh = E // num_heads
    scale = 1.0 / np.sqrt(Dh)

    q = query @ params["wq"].T + params["bq"]
    k = key_value @ params["wk"].T + params["bk"]
    v = key_value @ params["wv"].T + params["bv"]

    q = q.reshape(B, Lq, num_heads, Dh).transpose(0, 2, 1, 3)
    k = k.reshape(B, Lkv, num_heads, Dh).transpose(0, 2, 1, 3)
    v = v.reshape(B, Lkv, num_heads, Dh).transpose(0, 2, 1, 3)

    s = jnp.einsum("bhqd,bhkd->bhqk", q, k) * scale
    attn = jax.nn.softmax(s, axis=-1)
    ctx = jnp.einsum("bhqk,bhkd->bhqd", attn, v)
    ctx = ctx.transpose(0, 2, 1, 3).reshape(B, Lq, E)

    attn_out = ctx @ params["wo"].T + params["bo"]

    y = query + attn_out
    mean = jnp.mean(y, axis=-1, keepdims=True)
    var = jnp.mean((y - mean) ** 2, axis=-1, keepdims=True)
    y = (y - mean) / jnp.sqrt(var + 1e-5)
    return y * params["ln_gamma"] + params["ln_beta"]


# ----------------------------------------------------------------------------
# Main
# ----------------------------------------------------------------------------
if __name__ == "__main__":
    # Small shapes consistent with the module; E and Lkv are lane multiples
    # (like the module's real E=768 and tiled KV lengths) so every matmul
    # operand, score tile and store is lane-dense.
    B, Lq, Lkv, E, H = 2, 16, 128, 128, 8

    key = jax.random.PRNGKey(0)
    ks = jax.random.split(key, 10)

    params = {
        "wq": 0.05 * jax.random.normal(ks[0], (E, E), jnp.float32),
        "wk": 0.05 * jax.random.normal(ks[1], (E, E), jnp.float32),
        "wv": 0.05 * jax.random.normal(ks[2], (E, E), jnp.float32),
        "bq": 0.01 * jax.random.normal(ks[3], (E,), jnp.float32),
        "bk": 0.01 * jax.random.normal(ks[4], (E,), jnp.float32),
        "bv": 0.01 * jax.random.normal(ks[5], (E,), jnp.float32),
        "wo": 0.05 * jax.random.normal(ks[6], (E, E), jnp.float32),
        "bo": 0.01 * jax.random.normal(ks[7], (E,), jnp.float32),
        "ln_gamma": jnp.ones((E,), jnp.float32),
        "ln_beta": jnp.zeros((E,), jnp.float32),
    }

    query = jax.random.normal(ks[8], (B, Lq, E), jnp.float32)
    key_value = jax.random.normal(ks[9], (B, Lkv, E), jnp.float32)

    ref = ref_forward(query, key_value, params, num_heads=H)

    # f32 MXU path (torch-parity numerics; EUP approx reciprocal ~1e-3 rel).
    out = jax.block_until_ready(
        cross_attention(query, key_value, params, num_heads=H))
    assert out.shape == (B, Lq, E)
    np.testing.assert_allclose(np.asarray(out), np.asarray(ref),
                               rtol=5e-3, atol=5e-3)

    # bf16 MXU-operand path (valid on v5e/v6e/v7x): f32 accumulation and f32
    # softmax / LayerNorm / residual; documented as lower-precision vs torch.
    out_bf16 = jax.block_until_ready(
        cross_attention(query, key_value, params, num_heads=H,
                        mxu_dtype=jnp.bfloat16))
    np.testing.assert_allclose(np.asarray(out_bf16), np.asarray(ref),
                               rtol=5e-2, atol=5e-2)

    print("KERNEL_OK")
</pallas_src>

<mosaic_0001>
module attributes {stable_mosaic.version = 11 : i64} {
  func.func @cross_attn_kernel(%arg0: i32, %arg1: memref<1x16x128xf32, #tpu.memory_space<vmem>>, %arg2: memref<1x128x128xf32, #tpu.memory_space<vmem>>, %arg3: memref<128x128xf32, #tpu.memory_space<vmem>>, %arg4: memref<1x128xf32, #tpu.memory_space<vmem>>, %arg5: memref<128x256xf32, #tpu.memory_space<vmem>>, %arg6: memref<1x256xf32, #tpu.memory_space<vmem>>, %arg7: memref<128x128xf32, #tpu.memory_space<vmem>>, %arg8: memref<3x128xf32, #tpu.memory_space<vmem>>, %arg9: memref<1x16x128xf32, #tpu.memory_space<vmem>>) attributes {dimension_semantics = [#tpu.dimension_semantics<parallel>], iteration_bounds = array<i64: 2>, scalar_prefetch = 0 : i64, scratch_operands = 0 : i64, tpu.core_type = #tpu.core_type<tc>, window_params = [{transform_indices = @transform_0, window_bounds = array<i64: 1, 16, 128>}, {transform_indices = @transform_1, window_bounds = array<i64: 1, 128, 128>}, {pipeline_mode = #tpu.pipeline_mode<synchronous>, transform_indices = @transform_2, window_bounds = array<i64: 128, 128>}, {pipeline_mode = #tpu.pipeline_mode<synchronous>, transform_indices = @transform_3, window_bounds = array<i64: 1, 128>}, {pipeline_mode = #tpu.pipeline_mode<synchronous>, transform_indices = @transform_4, window_bounds = array<i64: 128, 256>}, {pipeline_mode = #tpu.pipeline_mode<synchronous>, transform_indices = @transform_5, window_bounds = array<i64: 1, 256>}, {pipeline_mode = #tpu.pipeline_mode<synchronous>, transform_indices = @transform_6, window_bounds = array<i64: 128, 128>}, {pipeline_mode = #tpu.pipeline_mode<synchronous>, transform_indices = @transform_7, window_bounds = array<i64: 3, 128>}, {transform_indices = @transform_8, window_bounds = array<i64: 1, 16, 128>}]} {
    %c0 = arith.constant 0 : index
    %c0_0 = arith.constant 0 : index
    %c0_1 = arith.constant 0 : index
    %0 = vector.load %arg1[%c0, %c0_0, %c0_1] : memref<1x16x128xf32, #tpu.memory_space<vmem>>, vector<1x16x128xf32>
    %1 = vector.shape_cast %0 : vector<1x16x128xf32> to vector<16x128xf32>
    %c0_2 = arith.constant 0 : index
    %c0_3 = arith.constant 0 : index
    %c0_4 = arith.constant 0 : index
    %2 = vector.load %arg2[%c0_2, %c0_3, %c0_4] : memref<1x128x128xf32, #tpu.memory_space<vmem>>, vector<1x128x128xf32>
    %3 = vector.shape_cast %2 : vector<1x128x128xf32> to vector<128x128xf32>
    %c0_5 = arith.constant 0 : index
    %c0_6 = arith.constant 0 : index
    %4 = vector.load %arg3[%c0_5, %c0_6] : memref<128x128xf32, #tpu.memory_space<vmem>>, vector<128x128xf32>
    %c0_7 = arith.constant 0 : index
    %c0_8 = arith.constant 0 : index
    %5 = vector.load %arg5[%c0_7, %c0_8] : memref<128x256xf32, #tpu.memory_space<vmem>>, vector<128x256xf32>
    %c0_9 = arith.constant 0 : index
    %c0_10 = arith.constant 0 : index
    %6 = vector.load %arg7[%c0_9, %c0_10] : memref<128x128xf32, #tpu.memory_space<vmem>>, vector<128x128xf32>
    %c0_11 = arith.constant 0 : index
    %c0_12 = arith.constant 0 : index
    %7 = vector.load %arg4[%c0_11, %c0_12] : memref<1x128xf32, #tpu.memory_space<vmem>>, vector<1x128xf32>
    %c0_13 = arith.constant 0 : index
    %c0_14 = arith.constant 0 : index
    %8 = vector.load %arg6[%c0_13, %c0_14] : memref<1x256xf32, #tpu.memory_space<vmem>>, vector<1x256xf32>
    %c0_15 = arith.constant 0 : index
    %c0_16 = arith.constant 0 : index
    %9 = vector.load %arg8[%c0_15, %c0_16] : memref<3x128xf32, #tpu.memory_space<vmem>>, vector<3x128xf32>
    %cst = arith.constant dense<0.000000e+00> : vector<16x128xf32>
    %10 = tpu.matmul %1, %4, %cst {dimension_numbers = #tpu.dot_dimension_numbers<[1], [0], [0], [1], [0, 0, 1, 1], [], []>} : vector<16x128xf32>, vector<128x128xf32>, vector<16x128xf32> -> vector<16x128xf32>
    %11 = vector.broadcast %7 : vector<1x128xf32> to vector<16x128xf32>
    %12 = arith.addf %10, %11 : vector<16x128xf32>
    %cst_17 = arith.constant dense<0.000000e+00> : vector<128x256xf32>
    %13 = tpu.matmul %3, %5, %cst_17 {dimension_numbers = #tpu.dot_dimension_numbers<[1], [0], [0], [1], [0, 0, 1, 1], [], []>} : vector<128x128xf32>, vector<128x256xf32>, vector<128x256xf32> -> vector<128x256xf32>
    %14 = vector.broadcast %8 : vector<1x256xf32> to vector<128x256xf32>
    %15 = arith.addf %13, %14 : vector<128x256xf32>
    %16 = vector.extract_strided_slice %15 {offsets = [0, 0], sizes = [128, 128], strides = [1, 1]} : vector<128x256xf32> to vector<128x128xf32>
    %17 = vector.extract_strided_slice %15 {offsets = [0, 128], sizes = [128, 128], strides = [1, 1]} : vector<128x256xf32> to vector<128x128xf32>
    %18 = vector.extract_strided_slice %12 {offsets = [0, 0], sizes = [16, 16], strides = [1, 1]} : vector<16x128xf32> to vector<16x16xf32>
    %19 = vector.extract_strided_slice %16 {offsets = [0, 0], sizes = [128, 16], strides = [1, 1]} : vector<128x128xf32> to vector<128x16xf32>
    %20 = vector.extract_strided_slice %17 {offsets = [0, 0], sizes = [128, 16], strides = [1, 1]} : vector<128x128xf32> to vector<128x16xf32>
    "tpu.trace_start"() <{level = 10 : i32, message = "qd,kd->qk"}> : () -> ()
    %cst_18 = arith.constant dense<0.000000e+00> : vector<16x128xf32>
    %21 = tpu.matmul %18, %19, %cst_18 {dimension_numbers = #tpu.dot_dimension_numbers<[1], [1], [0], [0], [0, 0, 1, 0], [], []>} : vector<16x16xf32>, vector<128x16xf32>, vector<16x128xf32> -> vector<16x128xf32>
    "tpu.trace_stop"() : () -> ()
    %cst_19 = arith.constant dense<0xFF800000> : vector<16xf32>
    %22 = vector.multi_reduction <maximumf>, %21, %cst_19 [1] : vector<16x128xf32> to vector<16xf32>
    %23 = vector.shape_cast %22 : vector<16xf32> to vector<16x1xf32>
    %24 = vector.broadcast %23 : vector<16x1xf32> to vector<16x128xf32>
    %25 = arith.subf %21, %24 : vector<16x128xf32>
    %26 = math.exp %25 : vector<16x128xf32>
    %cst_20 = arith.constant dense<0.000000e+00> : vector<16xf32>
    %27 = vector.multi_reduction <add>, %26, %cst_20 [1] : vector<16x128xf32> to vector<16xf32>
    %28 = vector.shape_cast %27 : vector<16xf32> to vector<16x1xf32>
    %29 = tpu.reciprocal %28 {approx = true} : vector<16x1xf32> -> vector<16x1xf32>
    %30 = vector.broadcast %29 : vector<16x1xf32> to vector<16x128xf32>
    %31 = arith.mulf %26, %30 : vector<16x128xf32>
    %cst_21 = arith.constant dense<0.000000e+00> : vector<16x16xf32>
    %32 = tpu.matmul %31, %20, %cst_21 {dimension_numbers = #tpu.dot_dimension_numbers<[1], [0], [0], [1], [0, 0, 1, 1], [], []>} : vector<16x128xf32>, vector<128x16xf32>, vector<16x16xf32> -> vector<16x16xf32>
    %33 = vector.extract_strided_slice %12 {offsets = [0, 16], sizes = [16, 16], strides = [1, 1]} : vector<16x128xf32> to vector<16x16xf32>
    %34 = vector.extract_strided_slice %16 {offsets = [0, 16], sizes = [128, 16], strides = [1, 1]} : vector<128x128xf32> to vector<128x16xf32>
    %35 = vector.extract_strided_slice %17 {offsets = [0, 16], sizes = [128, 16], strides = [1, 1]} : vector<128x128xf32> to vector<128x16xf32>
    "tpu.trace_start"() <{level = 10 : i32, message = "qd,kd->qk"}> : () -> ()
    %cst_22 = arith.constant dense<0.000000e+00> : vector<16x128xf32>
    %36 = tpu.matmul %33, %34, %cst_22 {dimension_numbers = #tpu.dot_dimension_numbers<[1], [1], [0], [0], [0, 0, 1, 0], [], []>} : vector<16x16xf32>, vector<128x16xf32>, vector<16x128xf32> -> vector<16x128xf32>
    "tpu.trace_stop"() : () -> ()
    %cst_23 = arith.constant dense<0xFF800000> : vector<16xf32>
    %37 = vector.multi_reduction <maximumf>, %36, %cst_23 [1] : vector<16x128xf32> to vector<16xf32>
    %38 = vector.shape_cast %37 : vector<16xf32> to vector<16x1xf32>
    %39 = vector.broadcast %38 : vector<16x1xf32> to vector<16x128xf32>
    %40 = arith.subf %36, %39 : vector<16x128xf32>
    %41 = math.exp %40 : vector<16x128xf32>
    %cst_24 = arith.constant dense<0.000000e+00> : vector<16xf32>
    %42 = vector.multi_reduction <add>, %41, %cst_24 [1] : vector<16x128xf32> to vector<16xf32>
    %43 = vector.shape_cast %42 : vector<16xf32> to vector<16x1xf32>
    %44 = tpu.reciprocal %43 {approx = true} : vector<16x1xf32> -> vector<16x1xf32>
    %45 = vector.broadcast %44 : vector<16x1xf32> to vector<16x128xf32>
    %46 = arith.mulf %41, %45 : vector<16x128xf32>
    %cst_25 = arith.constant dense<0.000000e+00> : vector<16x16xf32>
    %47 = tpu.matmul %46, %35, %cst_25 {dimension_numbers = #tpu.dot_dimension_numbers<[1], [0], [0], [1], [0, 0, 1, 1], [], []>} : vector<16x128xf32>, vector<128x16xf32>, vector<16x16xf32> -> vector<16x16xf32>
    %48 = vector.extract_strided_slice %12 {offsets = [0, 32], sizes = [16, 16], strides = [1, 1]} : vector<16x128xf32> to vector<16x16xf32>
    %49 = vector.extract_strided_slice %16 {offsets = [0, 32], sizes = [128, 16], strides = [1, 1]} : vector<128x128xf32> to vector<128x16xf32>
    %50 = vector.extract_strided_slice %17 {offsets = [0, 32], sizes = [128, 16], strides = [1, 1]} : vector<128x128xf32> to vector<128x16xf32>
    "tpu.trace_start"() <{level = 10 : i32, message = "qd,kd->qk"}> : () -> ()
    %cst_26 = arith.constant dense<0.000000e+00> : vector<16x128xf32>
    %51 = tpu.matmul %48, %49, %cst_26 {dimension_numbers = #tpu.dot_dimension_numbers<[1], [1], [0], [0], [0, 0, 1, 0], [], []>} : vector<16x16xf32>, vector<128x16xf32>, vector<16x128xf32> -> vector<16x128xf32>
    "tpu.trace_stop"() : () -> ()
    %cst_27 = arith.constant dense<0xFF800000> : vector<16xf32>
    %52 = vector.multi_reduction <maximumf>, %51, %cst_27 [1] : vector<16x128xf32> to vector<16xf32>
    %53 = vector.shape_cast %52 : vector<16xf32> to vector<16x1xf32>
    %54 = vector.broadcast %53 : vector<16x1xf32> to vector<16x128xf32>
    %55 = arith.subf %51, %54 : vector<16x128xf32>
    %56 = math.exp %55 : vector<16x128xf32>
    %cst_28 = arith.constant dense<0.000000e+00> : vector<16xf32>
    %57 = vector.multi_reduction <add>, %56, %cst_28 [1] : vector<16x128xf32> to vector<16xf32>
    %58 = vector.shape_cast %57 : vector<16xf32> to vector<16x1xf32>
    %59 = tpu.reciprocal %58 {approx = true} : vector<16x1xf32> -> vector<16x1xf32>
    %60 = vector.broadcast %59 : vector<16x1xf32> to vector<16x128xf32>
    %61 = arith.mulf %56, %60 : vector<16x128xf32>
    %cst_29 = arith.constant dense<0.000000e+00> : vector<16x16xf32>
    %62 = tpu.matmul %61, %50, %cst_29 {dimension_numbers = #tpu.dot_dimension_numbers<[1], [0], [0], [1], [0, 0, 1, 1], [], []>} : vector<16x128xf32>, vector<128x16xf32>, vector<16x16xf32> -> vector<16x16xf32>
    %63 = vector.extract_strided_slice %12 {offsets = [0, 48], sizes = [16, 16], strides = [1, 1]} : vector<16x128xf32> to vector<16x16xf32>
    %64 = vector.extract_strided_slice %16 {offsets = [0, 48], sizes = [128, 16], strides = [1, 1]} : vector<128x128xf32> to vector<128x16xf32>
    %65 = vector.extract_strided_slice %17 {offsets = [0, 48], sizes = [128, 16], strides = [1, 1]} : vector<128x128xf32> to vector<128x16xf32>
    "tpu.trace_start"() <{level = 10 : i32, message = "qd,kd->qk"}> : () -> ()
    %cst_30 = arith.constant dense<0.000000e+00> : vector<16x128xf32>
    %66 = tpu.matmul %63, %64, %cst_30 {dimension_numbers = #tpu.dot_dimension_numbers<[1], [1], [0], [0], [0, 0, 1, 0], [], []>} : vector<16x16xf32>, vector<128x16xf32>, vector<16x128xf32> -> vector<16x128xf32>
    "tpu.trace_stop"() : () -> ()
    %cst_31 = arith.constant dense<0xFF800000> : vector<16xf32>
    %67 = vector.multi_reduction <maximumf>, %66, %cst_31 [1] : vector<16x128xf32> to vector<16xf32>
    %68 = vector.shape_cast %67 : vector<16xf32> to vector<16x1xf32>
    %69 = vector.broadcast %68 : vector<16x1xf32> to vector<16x128xf32>
    %70 = arith.subf %66, %69 : vector<16x128xf32>
    %71 = math.exp %70 : vector<16x128xf32>
    %cst_32 = arith.constant dense<0.000000e+00> : vector<16xf32>
    %72 = vector.multi_reduction <add>, %71, %cst_32 [1] : vector<16x128xf32> to vector<16xf32>
    %73 = vector.shape_cast %72 : vector<16xf32> to vector<16x1xf32>
    %74 = tpu.reciprocal %73 {approx = true} : vector<16x1xf32> -> vector<16x1xf32>
    %75 = vector.broadcast %74 : vector<16x1xf32> to vector<16x128xf32>
    %76 = arith.mulf %71, %75 : vector<16x128xf32>
    %cst_33 = arith.constant dense<0.000000e+00> : vector<16x16xf32>
    %77 = tpu.matmul %76, %65, %cst_33 {dimension_numbers = #tpu.dot_dimension_numbers<[1], [0], [0], [1], [0, 0, 1, 1], [], []>} : vector<16x128xf32>, vector<128x16xf32>, vector<16x16xf32> -> vector<16x16xf32>
    %78 = vector.extract_strided_slice %12 {offsets = [0, 64], sizes = [16, 16], strides = [1, 1]} : vector<16x128xf32> to vector<16x16xf32>
    %79 = vector.extract_strided_slice %16 {offsets = [0, 64], sizes = [128, 16], strides = [1, 1]} : vector<128x128xf32> to vector<128x16xf32>
    %80 = vector.extract_strided_slice %17 {offsets = [0, 64], sizes = [128, 16], strides = [1, 1]} : vector<128x128xf32> to vector<128x16xf32>
    "tpu.trace_start"() <{level = 10 : i32, message = "qd,kd->qk"}> : () -> ()
    %cst_34 = arith.constant dense<0.000000e+00> : vector<16x128xf32>
    %81 = tpu.matmul %78, %79, %cst_34 {dimension_numbers = #tpu.dot_dimension_numbers<[1], [1], [0], [0], [0, 0, 1, 0], [], []>} : vector<16x16xf32>, vector<128x16xf32>, vector<16x128xf32> -> vector<16x128xf32>
    "tpu.trace_stop"() : () -> ()
    %cst_35 = arith.constant dense<0xFF800000> : vector<16xf32>
    %82 = vector.multi_reduction <maximumf>, %81, %cst_35 [1] : vector<16x128xf32> to vector<16xf32>
    %83 = vector.shape_cast %82 : vector<16xf32> to vector<16x1xf32>
    %84 = vector.broadcast %83 : vector<16x1xf32> to vector<16x128xf32>
    %85 = arith.subf %81, %84 : vector<16x128xf32>
    %86 = math.exp %85 : vector<16x128xf32>
    %cst_36 = arith.constant dense<0.000000e+00> : vector<16xf32>
    %87 = vector.multi_reduction <add>, %86, %cst_36 [1] : vector<16x128xf32> to vector<16xf32>
    %88 = vector.shape_cast %87 : vector<16xf32> to vector<16x1xf32>
    %89 = tpu.reciprocal %88 {approx = true} : vector<16x1xf32> -> vector<16x1xf32>
    %90 = vector.broadcast %89 : vector<16x1xf32> to vector<16x128xf32>
    %91 = arith.mulf %86, %90 : vector<16x128xf32>
    %cst_37 = arith.constant dense<0.000000e+00> : vector<16x16xf32>
    %92 = tpu.matmul %91, %80, %cst_37 {dimension_numbers = #tpu.dot_dimension_numbers<[1], [0], [0], [1], [0, 0, 1, 1], [], []>} : vector<16x128xf32>, vector<128x16xf32>, vector<16x16xf32> -> vector<16x16xf32>
    %93 = vector.extract_strided_slice %12 {offsets = [0, 80], sizes = [16, 16], strides = [1, 1]} : vector<16x128xf32> to vector<16x16xf32>
    %94 = vector.extract_strided_slice %16 {offsets = [0, 80], sizes = [128, 16], strides = [1, 1]} : vector<128x128xf32> to vector<128x16xf32>
    %95 = vector.extract_strided_slice %17 {offsets = [0, 80], sizes = [128, 16], strides = [1, 1]} : vector<128x128xf32> to vector<128x16xf32>
    "tpu.trace_start"() <{level = 10 : i32, message = "qd,kd->qk"}> : () -> ()
    %cst_38 = arith.constant dense<0.000000e+00> : vector<16x128xf32>
    %96 = tpu.matmul %93, %94, %cst_38 {dimension_numbers = #tpu.dot_dimension_numbers<[1], [1], [0], [0], [0, 0, 1, 0], [], []>} : vector<16x16xf32>, vector<128x16xf32>, vector<16x128xf32> -> vector<16x128xf32>
    "tpu.trace_stop"() : () -> ()
    %cst_39 = arith.constant dense<0xFF800000> : vector<16xf32>
    %97 = vector.multi_reduction <maximumf>, %96, %cst_39 [1] : vector<16x128xf32> to vector<16xf32>
    %98 = vector.shape_cast %97 : vector<16xf32> to vector<16x1xf32>
    %99 = vector.broadcast %98 : vector<16x1xf32> to vector<16x128xf32>
    %100 = arith.subf %96, %99 : vector<16x128xf32>
    %101 = math.exp %100 : vector<16x128xf32>
    %cst_40 = arith.constant dense<0.000000e+00> : vector<16xf32>
    %102 = vector.multi_reduction <add>, %101, %cst_40 [1] : vector<16x128xf32> to vector<16xf32>
    %103 = vector.shape_cast %102 : vector<16xf32> to vector<16x1xf32>
    %104 = tpu.reciprocal %103 {approx = true} : vector<16x1xf32> -> vector<16x1xf32>
    %105 = vector.broadcast %104 : vector<16x1xf32> to vector<16x128xf32>
    %106 = arith.mulf %101, %105 : vector<16x128xf32>
    %cst_41 = arith.constant dense<0.000000e+00> : vector<16x16xf32>
    %107 = tpu.matmul %106, %95, %cst_41 {dimension_numbers = #tpu.dot_dimension_numbers<[1], [0], [0], [1], [0, 0, 1, 1], [], []>} : vector<16x128xf32>, vector<128x16xf32>, vector<16x16xf32> -> vector<16x16xf32>
    %108 = vector.extract_strided_slice %12 {offsets = [0, 96], sizes = [16, 16], strides = [1, 1]} : vector<16x128xf32> to vector<16x16xf32>
    %109 = vector.extract_strided_slice %16 {offsets = [0, 96], sizes = [128, 16], strides = [1, 1]} : vector<128x128xf32> to vector<128x16xf32>
    %110 = vector.extract_strided_slice %17 {offsets = [0, 96], sizes = [128, 16], strides = [1, 1]} : vector<128x128xf32> to vector<128x16xf32>
    "tpu.trace_start"() <{level = 10 : i32, message = "qd,kd->qk"}> : () -> ()
    %cst_42 = arith.constant dense<0.000000e+00> : vector<16x128xf32>
    %111 = tpu.matmul %108, %109, %cst_42 {dimension_numbers = #tpu.dot_dimension_numbers<[1], [1], [0], [0], [0, 0, 1, 0], [], []>} : vector<16x16xf32>, vector<128x16xf32>, vector<16x128xf32> -> vector<16x128xf32>
    "tpu.trace_stop"() : () -> ()
    %cst_43 = arith.constant dense<0xFF800000> : vector<16xf32>
    %112 = vector.multi_reduction <maximumf>, %111, %cst_43 [1] : vector<16x128xf32> to vector<16xf32>
    %113 = vector.shape_cast %112 : vector<16xf32> to vector<16x1xf32>
    %114 = vector.broadcast %113 : vector<16x1xf32> to vector<16x128xf32>
    %115 = arith.subf %111, %114 : vector<16x128xf32>
    %116 = math.exp %115 : vector<16x128xf32>
    %cst_44 = arith.constant dense<0.000000e+00> : vector<16xf32>
    %117 = vector.multi_reduction <add>, %116, %cst_44 [1] : vector<16x128xf32> to vector<16xf32>
    %118 = vector.shape_cast %117 : vector<16xf32> to vector<16x1xf32>
    %119 = tpu.reciprocal %118 {approx = true} : vector<16x1xf32> -> vector<16x1xf32>
    %120 = vector.broadcast %119 : vector<16x1xf32> to vector<16x128xf32>
    %121 = arith.mulf %116, %120 : vector<16x128xf32>
    %cst_45 = arith.constant dense<0.000000e+00> : vector<16x16xf32>
    %122 = tpu.matmul %121, %110, %cst_45 {dimension_numbers = #tpu.dot_dimension_numbers<[1], [0], [0], [1], [0, 0, 1, 1], [], []>} : vector<16x128xf32>, vector<128x16xf32>, vector<16x16xf32> -> vector<16x16xf32>
    %123 = vector.extract_strided_slice %12 {offsets = [0, 112], sizes = [16, 16], strides = [1, 1]} : vector<16x128xf32> to vector<16x16xf32>
    %124 = vector.extract_strided_slice %16 {offsets = [0, 112], sizes = [128, 16], strides = [1, 1]} : vector<128x128xf32> to vector<128x16xf32>
    %125 = vector.extract_strided_slice %17 {offsets = [0, 112], sizes = [128, 16], strides = [1, 1]} : vector<128x128xf32> to vector<128x16xf32>
    "tpu.trace_start"() <{level = 10 : i32, message = "qd,kd->qk"}> : () -> ()
    %cst_46 = arith.constant dense<0.000000e+00> : vector<16x128xf32>
    %126 = tpu.matmul %123, %124, %cst_46 {dimension_numbers = #tpu.dot_dimension_numbers<[1], [1], [0], [0], [0, 0, 1, 0], [], []>} : vector<16x16xf32>, vector<128x16xf32>, vector<16x128xf32> -> vector<16x128xf32>
    "tpu.trace_stop"() : () -> ()
    %cst_47 = arith.constant dense<0xFF800000> : vector<16xf32>
    %127 = vector.multi_reduction <maximumf>, %126, %cst_47 [1] : vector<16x128xf32> to vector<16xf32>
    %128 = vector.shape_cast %127 : vector<16xf32> to vector<16x1xf32>
    %129 = vector.broadcast %128 : vector<16x1xf32> to vector<16x128xf32>
    %130 = arith.subf %126, %129 : vector<16x128xf32>
    %131 = math.exp %130 : vector<16x128xf32>
    %cst_48 = arith.constant dense<0.000000e+00> : vector<16xf32>
    %132 = vector.multi_reduction <add>, %131, %cst_48 [1] : vector<16x128xf32> to vector<16xf32>
    %133 = vector.shape_cast %132 : vector<16xf32> to vector<16x1xf32>
    %134 = tpu.reciprocal %133 {approx = true} : vector<16x1xf32> -> vector<16x1xf32>
    %135 = vector.broadcast %134 : vector<16x1xf32> to vector<16x128xf32>
    %136 = arith.mulf %131, %135 : vector<16x128xf32>
    %cst_49 = arith.constant dense<0.000000e+00> : vector<16x16xf32>
    %137 = tpu.matmul %136, %125, %cst_49 {dimension_numbers = #tpu.dot_dimension_numbers<[1], [0], [0], [1], [0, 0, 1, 1], [], []>} : vector<16x128xf32>, vector<128x16xf32>, vector<16x16xf32> -> vector<16x16xf32>
    %138 = tpu.concatenate %32, %47, %62, %77, %92, %107, %122, %137 in 1 : vector<16x16xf32>, vector<16x16xf32>, vector<16x16xf32>, vector<16x16xf32>, vector<16x16xf32>, vector<16x16xf32>, vector<16x16xf32>, vector<16x16xf32> -> vector<16x128xf32>
    %cst_50 = arith.constant dense<0.000000e+00> : vector<16x128xf32>
    %139 = tpu.matmul %138, %6, %cst_50 {dimension_numbers = #tpu.dot_dimension_numbers<[1], [0], [0], [1], [0, 0, 1, 1], [], []>} : vector<16x128xf32>, vector<128x128xf32>, vector<16x128xf32> -> vector<16x128xf32>
    %140 = vector.extract_strided_slice %9 {offsets = [0, 0], sizes = [1, 128], strides = [1, 1]} : vector<3x128xf32> to vector<1x128xf32>
    %141 = vector.broadcast %140 : vector<1x128xf32> to vector<16x128xf32>
    %142 = arith.addf %139, %141 : vector<16x128xf32>
    %143 = arith.addf %1, %142 : vector<16x128xf32>
    %cst_51 = arith.constant dense<0.000000e+00> : vector<16xf32>
    %144 = vector.multi_reduction <add>, %143, %cst_51 [1] : vector<16x128xf32> to vector<16xf32>
    %145 = vector.shape_cast %144 : vector<16xf32> to vector<16x1xf32>
    %cst_52 = arith.constant 1.280000e+02 : f32
    %146 = vector.broadcast %cst_52 : f32 to vector<16x1xf32>
    %147 = arith.divf %145, %146 : vector<16x1xf32>
    %148 = vector.broadcast %147 : vector<16x1xf32> to vector<16x128xf32>
    %149 = arith.subf %143, %148 : vector<16x128xf32>
    %150 = arith.mulf %149, %149 : vector<16x128xf32>
    %cst_53 = arith.constant dense<0.000000e+00> : vector<16xf32>
    %151 = vector.multi_reduction <add>, %150, %cst_53 [1] : vector<16x128xf32> to vector<16xf32>
    %152 = vector.shape_cast %151 : vector<16xf32> to vector<16x1xf32>
    %cst_54 = arith.constant 1.280000e+02 : f32
    %153 = vector.broadcast %cst_54 : f32 to vector<16x1xf32>
    %154 = arith.divf %152, %153 : vector<16x1xf32>
    %155 = vector.broadcast %147 : vector<16x1xf32> to vector<16x128xf32>
    %156 = arith.subf %143, %155 : vector<16x128xf32>
    %cst_55 = arith.constant 9.99999974E-6 : f32
    %157 = vector.broadcast %cst_55 : f32 to vector<16x1xf32>
    %158 = arith.addf %154, %157 : vector<16x1xf32>
    %159 = math.rsqrt %158 : vector<16x1xf32>
    %160 = vector.broadcast %159 : vector<16x1xf32> to vector<16x128xf32>
    %161 = arith.mulf %156, %160 : vector<16x128xf32>
    %162 = vector.extract_strided_slice %9 {offsets = [1, 0], sizes = [1, 128], strides = [1, 1]} : vector<3x128xf32> to vector<1x128xf32>
    %163 = vector.broadcast %162 : vector<1x128xf32> to vector<16x128xf32>
    %164 = arith.mulf %161, %163 : vector<16x128xf32>
    %165 = vector.extract_strided_slice %9 {offsets = [2, 0], sizes = [1, 128], strides = [1, 1]} : vector<3x128xf32> to vector<1x128xf32>
    %166 = vector.broadcast %165 : vector<1x128xf32> to vector<16x128xf32>
    %167 = arith.addf %164, %166 : vector<16x128xf32>
    %c0_56 = arith.constant 0 : index
    %c0_57 = arith.constant 0 : index
    %c0_58 = arith.constant 0 : index
    %168 = vector.load %arg9[%c0_56, %c0_57, %c0_58] : memref<1x16x128xf32, #tpu.memory_space<vmem>>, vector<1x16x128xf32>
    %169 = vector.shape_cast %168 : vector<1x16x128xf32> to vector<16x128xf32>
    %170 = vector.shape_cast %167 : vector<16x128xf32> to vector<1x16x128xf32>
    tpu.vector_store %arg9[%c0_56, %c0_57, %c0_58], %170 {strides = array<i32>} : memref<1x16x128xf32, #tpu.memory_space<vmem>>, vector<1x16x128xf32>,
    return
  }
  func.func @transform_0(%arg0: i32) -> (i32, i32, i32) {
    %c0_i32 = arith.constant 0 : i32
    %c0_i32_0 = arith.constant 0 : i32
    %c0_i32_1 = arith.constant 0 : i32
    return %arg0, %c0_i32, %c0_i32_0 : i32, i32, i32
  }
  func.func @transform_1(%arg0: i32) -> (i32, i32, i32) {
    %c0_i32 = arith.constant 0 : i32
    %c0_i32_0 = arith.constant 0 : i32
    %c0_i32_1 = arith.constant 0 : i32
    return %arg0, %c0_i32, %c0_i32_0 : i32, i32, i32
  }
  func.func @transform_2(%arg0: i32) -> (i32, i32) {
    %c0_i32 = arith.constant 0 : i32
    %c0_i32_0 = arith.constant 0 : i32
    %c0_i32_1 = arith.constant 0 : i32
    return %c0_i32, %c0_i32_0 : i32, i32
  }
  func.func @transform_3(%arg0: i32) -> (i32, i32) {
    %c0_i32 = arith.constant 0 : i32
    %c0_i32_0 = arith.constant 0 : i32
    %c0_i32_1 = arith.constant 0 : i32
    return %c0_i32, %c0_i32_0 : i32, i32
  }
  func.func @transform_4(%arg0: i32) -> (i32, i32) {
    %c0_i32 = arith.constant 0 : i32
    %c0_i32_0 = arith.constant 0 : i32
    %c0_i32_1 = arith.constant 0 : i32
    return %c0_i32, %c0_i32_0 : i32, i32
  }
  func.func @transform_5(%arg0: i32) -> (i32, i32) {
    %c0_i32 = arith.constant 0 : i32
    %c0_i32_0 = arith.constant 0 : i32
    %c0_i32_1 = arith.constant 0 : i32
    return %c0_i32, %c0_i32_0 : i32, i32
  }
  func.func @transform_6(%arg0: i32) -> (i32, i32) {
    %c0_i32 = arith.constant 0 : i32
    %c0_i32_0 = arith.constant 0 : i32
    %c0_i32_1 = arith.constant 0 : i32
    return %c0_i32, %c0_i32_0 : i32, i32
  }
  func.func @transform_7(%arg0: i32) -> (i32, i32) {
    %c0_i32 = arith.constant 0 : i32
    %c0_i32_0 = arith.constant 0 : i32
    %c0_i32_1 = arith.constant 0 : i32
    return %c0_i32, %c0_i32_0 : i32, i32
  }
  func.func @transform_8(%arg0: i32) -> (i32, i32, i32) {
    %c0_i32 = arith.constant 0 : i32
    %c0_i32_0 = arith.constant 0 : i32
    %c0_i32_1 = arith.constant 0 : i32
    return %arg0, %c0_i32, %c0_i32_0 : i32, i32, i32
  }
}

</mosaic_0001>

<bundles_post_ra>
// kernel: tpu_custom_call.1
= control target key start
LH: loop header
LB: loop body
LE: loop exit
PB: predicated region body
PF: predicated region fallthrough
CT: control target
= control target key end

     0   :  { %s4601_s0 = inlined_call_operand.hbm [shape: f32[2,16,128], index: 0, kind: input, shape index: {}]   ;;  %s4602_s1 = inlined_call_operand.hbm [shape: f32[2,128,128], index: 1, kind: input, shape index: {}]   ;;  %s4603_s2 = inlined_call_operand.hbm [shape: f32[128,128], index: 2, kind: input, shape index: {}]   ;;  %s4604_s3 = inlined_call_operand.hbm [shape: f32[1,128], index: 3, kind: input, shape index: {}]   ;;  %s4605_s4 = inlined_call_operand.hbm [shape: f32[128,256], index: 4, kind: input, shape index: {}]   ;;  %s4606_s5 = inlined_call_operand.vmem [shape: f32[1,256], index: 5, kind: input, shape index: {}]   ;;  %s4607_s6 = inlined_call_operand.hbm [shape: f32[128,128], index: 6, kind: input, shape index: {}]   ;;  %s4608_s7 = inlined_call_operand.vmem [shape: f32[3,128], index: 7, kind: input, shape index: {}]   ;;  %s4609_s8 = inlined_call_operand.hbm [shape: f32[2,16,128], index: 8, kind: output, shape index: {}]  }
   0x1   :  { %4617 = sst [smem:[#allocation23_spill]] %s4603_s2 }
   0x2   :  { %4618 = sst [smem:[#allocation24_spill]] %s4604_s3 }
   0x3   :  { %4619 = sst [smem:[#allocation25_spill]] %s4605_s4 }
   0x4   :  { %4620 = sst [smem:[#allocation26_spill]] %s4607_s6 }
   0x5   :  { %13 = vsyncpa [#allocation3], 0 }
   0x6   :  { %15 = vsyncpa [#allocation3 + $0x1], 0 }
   0x7   :  { %16 = vsyncpa [#allocation6], 0 }
   0x8   :  { %18 = vsyncpa [#allocation6 + $0x1], 0 }
   0x9   :  { %19 = vsyncpa [#allocation9], 0 }
   0xa   :  { %20 = vsyncpa [#allocation12], 0 }
   0xb   :  { %21 = vsyncpa [#allocation4], 0 }
   0xc   :  { %23 = vsyncpa [#allocation4 + $0x1], 0  ;;  %s3387_s27 = smov 0   ;;  %s3389_s28 = smov 0  }
   0xd   :  { %s3391_s29 = smov 0   ;;  %s3393_s30 = smov 0  }
   0xe LB: > { %4621 = sst [smem:[#allocation20_spill]] %s3318_s29  ;;  %s3408_s9 = sadd.s32 4294967295, %s3322_s30   ;;  %s3322_s30 = sphi %s3393_s30, %s4637_s30   ;;  %s3318_s29 = sphi %s3391_s29, %s4639_s29   ;;  %s3314_s28 = sphi %s3389_s28, %s4641_s28   ;;  %s3310_s27 = sphi %s3387_s27, %s4640_s27  }
   0xf   : > { %s2408_s10 = sadd.s32 4294967294, %s3322_s30   ;;  %p49_p0 = scmp.ne.s32.totalorder %s3314_s28, %s3310_s27 }
  0x10   : > { %p50_p1 = scmp.eq.s32.totalorder %s3408_s9, 0  ;;  %p225_p2 = scmp.eq.s32.totalorder %s3408_s9, 1 }
  0x11   : > { %p231_p3 = scmp.eq.s32.totalorder %s2408_s10, 1  ;;  %p2409_p5 = scmp.ge.s32.totalorder %s3322_s30, 1 }
  0x12   : > { %p3417_p4 = por %p50_p1, %p49_p0  ;;  %p238_p7 = scmp.lt.s32.totalorder %s3322_s30, 3 }
  0x13   : > { %p3422_p6 = por %p231_p3, %p49_p0  ;;  %s4624_s2 = sld [smem:[#allocation23_spill]] }
  0x14   : > { %p3430_p8 = pnand %p2409_p5, %p238_p7  ;;  %s3324_s17 = smov [#allocation7]  }
  0x15   : > { %s251_s18 = sshll.u32 %s3324_s17, 4  ;;  %s4627_s3 = sld [smem:[#allocation24_spill]]  ;;  %s252_s18 = int_to_ptr.vmem [resolvable:$true] %s251_s18 }
  0x16   : > { %p2603_p9 = pneg %p3430_p8  ;;  %s4610_s23 = smov 128  }
  0x17   : > { %s4612_s24 = smov 8   ;;  %s3327_s25 = smov [#allocation8]  }
  0x18   : > { %p3438_p10 = pnand %p2603_p9, %p50_p1  ;;  %s266_s26 = sshll.u32 %s3327_s25, 4  ;;  %s267_s26 = int_to_ptr.vmem [resolvable:$true] %s266_s26 }
  0x19   : > { %s249_s15 = sshll.u32 %s4624_s2, 4  ;;  %s4628_s4 = sld [smem:[#allocation25_spill]]  ;;  %s250_s15 = int_to_ptr.hbm [resolvable:$true] %s249_s15 }
  0x1a   : > { %2606 = dma.hbm_to_vmem [thread:$0]  (!%p3438_p10), %s250_s15, 2048, %s252_s18, [#allocation6], %s4610_s23, %s4610_s23, %s4612_s24  }
  0x1b   : > { %s264_s22 = sshll.u32 %s4627_s3, 4  ;;  %s3328_s17 = smov [#allocation10]   ;;  %s265_s22 = int_to_ptr.hbm [resolvable:$true] %s264_s22 }
  0x1c   : > { %2609 = dma.hbm_to_vmem [thread:$0]  (!%p3438_p10), %s265_s22, 16, %s267_s26, [#allocation9]  }
  0x1d   : > { %s277_s20 = sshll.u32 %s3328_s17, 4  ;;  %s4629_s6 = sld [smem:[#allocation26_spill]]  ;;  %s278_s20 = int_to_ptr.vmem [resolvable:$true] %s277_s20 }
  0x1e   : > { %s3329_s25 = smov 256   ;;  %s3330_s10 = smov 16  }
  0x1f   : > { %s275_s14 = sshll.u32 %s4628_s4, 4  ;;  %s3331_s22 = smov [#allocation11]   ;;  %s276_s14 = int_to_ptr.hbm [resolvable:$true] %s275_s14 }
  0x20   : > { %2612 = dma.hbm_to_vmem [thread:$0]  (!%p3438_p10), %s276_s14, 4096, %s278_s20, [#allocation9], %s3329_s25, %s3329_s25, %s3330_s10  }
  0x21   : > { %s294_s26 = sshll.u32 %s3331_s22, 4  ;;  %s3467_s13 = sadd.s32 1, %s3322_s30   ;;  %s295_s26 = int_to_ptr.vmem [resolvable:$true] %s294_s26 }
  0x22   : > { %4630 = sst [smem:[#allocation21_spill]] %s3467_s13  ;;  %s36_s17 = sadd.s32 1, %s3318_s29 }
  0x23   : > { %s292_s21 = sshll.u32 %s4629_s6, 4  ;;  %s33_s15 = ssub.s32 %s3322_s30, %s3467_s13  ;;  %s293_s21 = int_to_ptr.hbm [resolvable:$true] %s292_s21 }
  0x24   : > { %2615 = dma.hbm_to_vmem [thread:$0]  (!%p3438_p10), %s293_s21, 2048, %s295_s26, [#allocation12], %s4610_s23, %s4610_s23, %s4612_s24  }
  0x25   : > { %p43_p12 = scmp.ne.s32.totalorder %s3318_s29, %s3314_s28  ;;  %p34_p13 = scmp.eq.s32.totalorder %s33_s15, 0 }
  0x26   : > { %p44_p0 = scmp.eq.s32.totalorder %s3322_s30, 0  ;;  %p2631_p5 = scmp.lt.s32.totalorder %s3322_s30, 2 }
  0x27   : > { %p3477_p3 = por %p225_p2, %p43_p12  ;;  %s3486_s20 = sand.u32 1, %s3318_s29  }
  0x28   : > { %s3483_s19 = scalar_select %p34_p13, %s3318_s29, %s36_s17  }
  0x29   : > { %p45_p7 = por %p44_p0, %p43_p12  ;;  %s2415_s18 = sshll.u32 %s3486_s20, 4 }
  0x2a   : > { %4632 = sst [smem:[#allocation22_spill]] %s3483_s19  ;;  %s2578_s21 = sshll.u32 %s3322_s30, 4 }
  0x2b   : > { %s320_s22 = scalar_lea.hbm %s4601_s0, %s2578_s21  ;;  %s315_s26 = scalar_lea.vmem [#allocation2], %s2415_s18 }
  0x2c   : > { %s323_s15 = sshll.u32 %s315_s26, 4  ;;  %s321_s23 = sshll.u32 %s320_s22, 4  ;;  %s324_s15 = int_to_ptr.vmem [resolvable:$true] %s323_s15  ;;  %s322_s23 = int_to_ptr.hbm [resolvable:$true] %s321_s23 }
  0x2d   : > { %p3493_p2 = pnand %p2631_p5, %p45_p7  ;;  %s333_s24 = sand.u32 1, %s3322_s30  }
  0x2e   : > { %s2418_s2 = sshll.u32 %s3486_s20, 7  ;;  %s312_s3 = scalar_lea.sflag [#allocation3], %s3486_s20 }
  0x2f   : > { %s3180_s4 = sshra.s32 %s322_s23, 4  ;;  %p3184_p10 = pneg %p3493_p2  ;;  %s3181_s4 = int_to_ptr.hbm [resolvable:$true] %s3180_s4 }
  0x30   : > { %s3182_s6 = scalar_lea.hbm %s3181_s4, 16  ;;  %s3187_s25 = scalar_lea.hbm %s4601_s0, 32 }
  0x31   : > { %p3183_p9 = scmp.ne.s32.totalorder %s3181_s4, %s3182_s6  ;;  %p3188_p0 = scmp.lt.s32.totalorder %s3181_s4, %s4601_s0 }
  0x32   : > { %p3189_p5 = scmp.lt.s32.totalorder %s3187_s25, %s3182_s6 }
  0x33   : > { %p3185_p12 = pnand %p3184_p10, %p3183_p9 }
  0x34   : > { %p3190_p7 = por %p3189_p5, %p3188_p0 }
  0x35   : > { %p3186_p13 = pneg %p3185_p12 }
  0x37   : > { %p3191_p11 = pnand %p3190_p7, %p3186_p13 }
  0x39   : > { %3194 = shalt.err (!%p3191_p11)
}
  0x3a   : > { %s4634_s20 = smov 8   ;;  %s4635_s26 = smov 128  }
  0x3b   : > { %2619 = dma.hbm_to_vmem [thread:$0]  (!%p3493_p2), %s322_s23, 256, %s324_s15, %s312_s3, %s4635_s26, %s4635_s26, %s4634_s20  }
  0x3c   : > { %s2579_s19 = sshll.u32 %s3322_s30, 7  ;;  %s337_s13 = scalar_lea.vmem [#allocation5], %s2418_s2 }
  0x3d   : > { %s342_s21 = scalar_lea.hbm %s4602_s1, %s2579_s19  ;;  %s345_s10 = sshll.u32 %s337_s13, 4  ;;  %s346_s10 = int_to_ptr.vmem [resolvable:$true] %s345_s10 }
  0x3e   : > { %s343_s4 = sshll.u32 %s342_s21, 4  ;;  %s334_s6 = scalar_lea.sflag [#allocation6], %s333_s24  ;;  %s344_s4 = int_to_ptr.hbm [resolvable:$true] %s343_s4 }
  0x3f   : > { %s3210_s25 = sshra.s32 %s344_s4, 4  ;;  %s3217_s15 = scalar_lea.hbm %s4602_s1, 256  ;;  %s3211_s25 = int_to_ptr.hbm [resolvable:$true] %s3210_s25 }
  0x40   : > { %s3212_s22 = scalar_lea.hbm %s3211_s25, 128  ;;  %p3218_p13 = scmp.lt.s32.totalorder %s3211_s25, %s4602_s1 }
  0x41   : > { %p3213_p11 = scmp.ne.s32.totalorder %s3211_s25, %s3212_s22  ;;  %p3219_p0 = scmp.lt.s32.totalorder %s3217_s15, %s3212_s22 }
  0x43   : > { %p3215_p9 = pnand %p3213_p11, %p3184_p10  ;;  %p3220_p5 = por %p3219_p0, %p3218_p13 }
  0x45   : > { %p3216_p12 = pneg %p3215_p9 }
  0x47   : > { %p3221_p7 = pnand %p3220_p5, %p3216_p12 }
  0x49   : > { %3224 = shalt.err (!%p3221_p7)
}
  0x4a   : > { %2622 = dma.hbm_to_vmem [thread:$0]  (!%p3493_p2), %s344_s4, 2048, %s346_s10, %s334_s6, %s4635_s26, %s4635_s26, %s4634_s20  }
  0x4b   : > { %357 = sbr.rel (%p3430_p8) target bundleno = 2779 (0xadb), region = 52  ;;  %s3537_s2 = sand.u32 (!%p3430_p8), 1, %s3314_s28  }
  0x4c   : > { %s2422_s24 = sshll.u32 (!%p3430_p8), %s3537_s2, 4  ;;  %s360_s13 = scalar_lea.sflag (!%p3430_p8), [#allocation3], %s3537_s2 }
  0x4d   : > { %s3543_s18 = scalar_lea.vmem (!%p3430_p8), [#allocation2], %s2422_s24 }
  0x50   : > { %3285 = dma.done.wait (%p3417_p4), %s360_s13, 256  }
  0x51   : > { %3287 = vsyncadd (%p3417_p4), %s360_s13, 4294967040  ;;  %s369_s16 = sand.u32 1, %s3408_s9   ;;  %s2423_s17 = sshll.u32 %s3537_s2, 7 }
  0x52   : > { %s370_s20 = scalar_lea.sflag [#allocation6], %s369_s16  ;;  %s3551_s26 = scalar_lea.vmem [#allocation5], %s2423_s17 }
  0x53   : > { %3289 = dma.done.wait (%p3417_p4), %s370_s20, 2048  }
  0x54   : > { %3291 = vsyncadd (%p3417_p4), %s370_s20, 4294965248 }
  0x55   : > { %3293 = dma.done.wait (%p50_p1), [#allocation6], 2048  }
  0x56   : > { %3295 = vsyncadd (%p50_p1), [#allocation6], 4294965248 }
  0x57   : > { %3297 = dma.done.wait (%p50_p1), [#allocation9], 4112  }
  0x58   : > { %3299 = vsyncadd (%p50_p1), [#allocation9], 4294963184 }
  0x59   : > { %3301 = dma.done.wait (%p50_p1), [#allocation12], 2048  }
  0x5a   : > { %3303 = vsyncadd (%p50_p1), [#allocation12], 4294965248  ;;  %v496_v0 = vld [vmem:[#allocation10 + $0xf0] sm:$0xff]  ;;  %v494_v1 = vld [vmem:[#allocation10 + $0xe0] sm:$0xff]  ;;  %s3332_s10 = smov 112   ;;  %s3333_s4 = smov 96  }
  0x5b   : > { %548 = vmatpush.msra.mxu1 %v496_v0  ;;  %v465_v2 = vld [vmem:[#allocation7 + $0x78] sm:$0xff]  ;;  %v464_v4 = vld [vmem:[#allocation7 + $0x70] sm:$0xff]  ;;  %v463_v5 = vld [vmem:[#allocation7 + $0x68] sm:$0xff]  ;;  %vm678_vm0 = vcmask 130048   ;;  %s3334_s6 = smov 80   ;;  %s3335_s25 = smov 64  }
  0x5c   : > { %v492_v3 = vld [vmem:[#allocation10 + $0xd0] sm:$0xff]  ;;  %520 = vmatpush.msra.mxu0 %v465_v2  ;;  %v490_v6 = vld [vmem:[#allocation10 + $0xc0] sm:$0xff]  ;;  %v497_v35 = vld [vmem:[#allocation10 + $0xf8] sm:$0xff]  ;;  %s3336_s22 = smov 48   ;;  %s3337_s3 = smov 32   ;;  %vm2159_vm1 = vcmask 261120  }
  0x5d   : > { %549 = vmatpush.msra.mxu1 %v494_v1  ;;  %v462_v7 = vld [vmem:[#allocation7 + $0x60] sm:$0xff]  ;;  %v488_v8 = vld [vmem:[#allocation10 + $0xb0] sm:$0xff]  ;;  %v459_v13 = vld [vmem:[#allocation7 + $0x48] sm:$0xff]  ;;  %613 = vmatpush.msra.mxu2 %v497_v35  ;;  %s3338_s23 = smov 16   ;;  %vm2162_vm2 = vcmask 392192   ;;  %vm2165_vm3 = vcmask 523264  }
  0x5e   : > { %521 = vmatpush.msra.mxu0 %v464_v4  ;;  %v461_v9 = vld [vmem:[#allocation7 + $0x58] sm:$0xff]  ;;  %v486_v10 = vld [vmem:[#allocation10 + $0xa0] sm:$0xff]  ;;  %v460_v11 = vld [vmem:[#allocation7 + $0x50] sm:$0xff]  ;;  %vm2168_vm4 = vcmask 654336   ;;  %vm2171_vm5 = vcmask 785408   ;;  %vm2174_vm6 = vcmask 916480  }
  0x5f   : > { %550 = vmatpush.msra.mxu1 %v492_v3  ;;  %v484_v12 = vld [vmem:[#allocation10 + $0x90] sm:$0xff]  ;;  %v482_v14 = vld [vmem:[#allocation10 + $0x80] sm:$0xff]  ;;  %v495_v36 = vld [vmem:[#allocation10 + $0xe8] sm:$0xff]  ;;  %s2580_s19 = sshll.u32 %s3408_s9, 4  ;;  %s431_s17 = scalar_lea.vmem [#allocation13], %s2422_s24 }
  0x60   : > { %522 = vmatpush.msra.mxu0 %v463_v5  ;;  %v458_v15 = vld [vmem:[#allocation7 + $0x40] sm:$0xff]  ;;  %v480_v16 = vld [vmem:[#allocation10 + $0x70] sm:$0xff]  ;;  %v455_v21 = vld [vmem:[#allocation7 + $0x28] sm:$0xff]  ;;  %614 = vmatpush.msra.mxu2 %v495_v36  ;;  %s2270_s16 = scalar_lea.hbm %s4609_s8, %s2580_s19  ;;  %s2271_s20 = sshll.u32 %s431_s17, 4  ;;  %s2272_s20 = int_to_ptr.vmem [resolvable:$true] %s2271_s20 }
  0x61   : > { %551 = vmatpush.msra.mxu1 %v490_v6  ;;  %v457_v17 = vld [vmem:[#allocation7 + $0x38] sm:$0xff]  ;;  %v478_v18 = vld [vmem:[#allocation10 + $0x60] sm:$0xff]  ;;  %v456_v19 = vld [vmem:[#allocation7 + $0x30] sm:$0xff]  ;;  %s2259_s9 = scalar_lea.sflag [#allocation4], %s3537_s2 }
  0x62   : > { %523 = vmatpush.msra.mxu0 %v462_v7  ;;  %v476_v20 = vld [vmem:[#allocation10 + $0x50] sm:$0xff]  ;;  %v474_v22 = vld [vmem:[#allocation10 + $0x40] sm:$0xff]  ;;  %v493_v37 = vld [vmem:[#allocation10 + $0xd8] sm:$0xff] }
  0x63   : > { %552 = vmatpush.msra.mxu1 %v488_v8  ;;  %v454_v23 = vld [vmem:[#allocation7 + $0x20] sm:$0xff]  ;;  %v472_v24 = vld [vmem:[#allocation10 + $0x30] sm:$0xff]  ;;  %v451_v29 = vld [vmem:[#allocation7 + $0x8] sm:$0xff]  ;;  %615 = vmatpush.msra.mxu2 %v493_v37 }
  0x64   : > { %524 = vmatpush.msra.mxu0 %v461_v9  ;;  %v453_v25 = vld [vmem:[#allocation7 + $0x18] sm:$0xff]  ;;  %v470_v26 = vld [vmem:[#allocation10 + $0x20] sm:$0xff]  ;;  %v452_v27 = vld [vmem:[#allocation7 + $0x10] sm:$0xff] }
  0x65   : > { %553 = vmatpush.msra.mxu1 %v486_v10  ;;  %v468_v28 = vld [vmem:[#allocation10 + $0x10] sm:$0xff]  ;;  %v466_v30 = vld [vmem:[#allocation10] sm:$0xff]  ;;  %v491_v38 = vld [vmem:[#allocation10 + $0xc8] sm:$0xff] }
  0x66   : > { %525 = vmatpush.msra.mxu0 %v460_v11  ;;  %v434_v31 = vld [vmem:[%s3551_s26] sm:$0xff]  ;;  %v435_v34 = vld [vmem:[%s3551_s26 + $0x8] sm:$0xff]  ;;  %v436_v39 = vld [vmem:[%s3551_s26 + $0x10] sm:$0xff]  ;;  %616 = vmatpush.msra.mxu2 %v491_v38 }
  0x67   : > { %554 = vmatpush.msra.mxu1 %v484_v12  ;;  %v450_v32 = vld [vmem:[#allocation7] sm:$0xff]  ;;  %v487_v41 = vld [vmem:[#allocation10 + $0xa8] sm:$0xff]  ;;  %v437_v44 = vld [vmem:[%s3551_s26 + $0x18] sm:$0xff] }
  0x68   : > { %526 = vmatpush.msra.mxu0 %v459_v13  ;;  %v432_v33 = vld [vmem:[%s3543_s18] sm:$0xff]  ;;  %v439_v54 = vld [vmem:[%s3551_s26 + $0x28] sm:$0xff]  ;;  %v441_v56 = vld [vmem:[%s3551_s26 + $0x38] sm:$0xff] }
  0x69   : > { %555 = vmatpush.msra.mxu1 %v482_v14  ;;  %v489_v40 = vld [vmem:[#allocation10 + $0xb8] sm:$0xff]  ;;  %v483_v43 = vld [vmem:[#allocation10 + $0x88] sm:$0xff] }
  0x6a   : > { %527 = vmatpush.msra.mxu0 %v458_v15  ;;  %617 = vmatpush.msra.mxu2 %v489_v40  ;;  %v485_v42 = vld [vmem:[#allocation10 + $0x98] sm:$0xff]  ;;  %v479_v46 = vld [vmem:[#allocation10 + $0x68] sm:$0xff] }
  0x6b   : > { %556 = vmatpush.msra.mxu1 %v480_v16  ;;  %v481_v45 = vld [vmem:[#allocation10 + $0x78] sm:$0xff]  ;;  %v475_v48 = vld [vmem:[#allocation10 + $0x48] sm:$0xff] }
  0x6c   : > { %528 = vmatpush.msra.mxu0 %v457_v17  ;;  %618 = vmatpush.msra.mxu2 %v487_v41  ;;  %v477_v47 = vld [vmem:[#allocation10 + $0x58] sm:$0xff]  ;;  %v471_v51 = vld [vmem:[#allocation10 + $0x28] sm:$0xff] }
  0x6d   : > { %557 = vmatpush.msra.mxu1 %v478_v18  ;;  %v438_v49 = vld [vmem:[%s3551_s26 + $0x20] sm:$0xff]  ;;  %v467_v53 = vld [vmem:[#allocation10 + $0x8] sm:$0xff]  ;;  %v445_v60 = vld [vmem:[%s3551_s26 + $0x58] sm:$0xff] }
  0x6e   : > { %529 = vmatpush.msra.mxu0 %v456_v19  ;;  %619 = vmatpush.msra.mxu2 %v485_v42  ;;  %v473_v50 = vld [vmem:[#allocation10 + $0x38] sm:$0xff]  ;;  %v440_v55 = vld [vmem:[%s3551_s26 + $0x30] sm:$0xff]  ;;  %v443_v58 = vld [vmem:[%s3551_s26 + $0x48] sm:$0xff] }
  0x6f   : > { %558 = vmatpush.msra.mxu1 %v476_v20  ;;  %v469_v52 = vld [vmem:[#allocation10 + $0x18] sm:$0xff]  ;;  %v444_v59 = vld [vmem:[%s3551_s26 + $0x50] sm:$0xff]  ;;  %v447_v62 = vld [vmem:[%s3551_s26 + $0x68] sm:$0xff] }
  0x70   : > { %530 = vmatpush.msra.mxu0 %v455_v21  ;;  %620 = vmatpush.msra.mxu2 %v483_v43  ;;  %v442_v57 = vld [vmem:[%s3551_s26 + $0x40] sm:$0xff]  ;;  %v448_v63 = vld [vmem:[%s3551_s26 + $0x70] sm:$0xff]  ;;  %v433_v0 = vld [vmem:[%s3543_s18 + $0x8] sm:$0xff] }
  0x71   : > { %559 = vmatpush.msra.mxu1 %v474_v22  ;;  %v446_v61 = vld [vmem:[%s3551_s26 + $0x60] sm:$0xff]  ;;  %v449_v1 = vld [vmem:[%s3551_s26 + $0x78] sm:$0xff]  ;;  %s2273_s26 = sshll.u32 %s2270_s16, 4  ;;  %s2274_s26 = int_to_ptr.hbm [resolvable:$true] %s2273_s26 }
  0x72   : > { %531 = vmatpush.msra.mxu0 %v454_v23  ;;  %621 = vmatpush.msra.mxu2 %v481_v45  ;;  %v3590_v2 = vld [vmem:[%s4606_s5] sm:$0x3]  ;;  %s3254_s11 = sshra.s32 %s2274_s26, 4  ;;  %s3255_s11 = int_to_ptr.hbm [resolvable:$true] %s3254_s11 }
  0x73   : > { %560 = vmatpush.msra.mxu1 %v472_v24  ;;  %v3593_v3 = vperm.slane %v3590_v2, 0  ;;  %v3600_v6 = vld [vmem:[#allocation8] ss:$0 sm:$0xff]  ;;  %s3256_s21 = scalar_lea.hbm %s3255_s11, 16  ;;  %p3261_p2 = scmp.lt.s32.totalorder %s3255_s11, %s4609_s8 }
  0x74   : > { %532 = vmatpush.msra.mxu0 %v453_v25  ;;  %622 = vmatpush.msra.mxu2 %v479_v46  ;;  %p3257_p1 = scmp.ne.s32.totalorder %s3255_s11, %s3256_s21 }
  0x75   : > { %561 = vmatpush.msra.mxu1 %v470_v26 }
  0x76   : > { %533 = vmatpush.msra.mxu0 %v452_v27  ;;  %623 = vmatpush.msra.mxu2 %v477_v47  ;;  %p3258_p4 = pnand %p3257_p1, %p3477_p3 }
  0x77   : > { %562 = vmatpush.msra.mxu1 %v468_v28 }
  0x78   : > { %534 = vmatpush.msra.mxu0 %v451_v29  ;;  %624 = vmatpush.msra.mxu2 %v475_v48  ;;  %p3259_p8 = pneg %p3258_p4 }
  0x79   : > { %563 = vmatpush.msra.mxu1 %v466_v30 }
  0x7a   : > { %564 = vmatmul.f32.vlgmr.msra.gmra.mxu1 %v434_v31  ;;  %535 = vmatpush.msra.mxu0 %v450_v32 }
  0x7b   : > { %536 = vmatmul.f32.vlgmr.msra.gmra.mxu0 %v432_v33  ;;  %625 = vmatpush.msra.mxu2 %v473_v50 }
  0x7d   : > { %626 = vmatpush.msra.mxu2 %v471_v51 }
  0x7f   : > { %627 = vmatpush.msra.mxu2 %v469_v52 }
  0x81   : > { %628 = vmatpush.msra.mxu2 %v467_v53 }
  0x82   : > { %567 = vmatmul.f32.gmra.mxu1 %v435_v34  ;;  %629 = vmatmul.f32.vlgmr.msra.gmra.mxu2 %v434_v31 }
  0x83   : > { %539 = vmatmul.f32.gmra.mxu0 %v433_v0 }
  0x8a   : > { %570 = vmatmul.f32.gmra.mxu1 %v436_v39  ;;  %632 = vmatmul.f32.gmra.mxu2 %v435_v34 }
  0x92   : > { %573 = vmatmul.f32.gmra.mxu1 %v437_v44  ;;  %635 = vmatmul.f32.gmra.mxu2 %v436_v39 }
  0x9a   : > { %576 = vmatmul.f32.gmra.mxu1 %v438_v49  ;;  %638 = vmatmul.f32.gmra.mxu2 %v437_v44 }
  0xa2   : > { %579 = vmatmul.f32.gmra.mxu1 %v439_v54  ;;  %641 = vmatmul.f32.gmra.mxu2 %v438_v49 }
  0xaa   : > { %582 = vmatmul.f32.gmra.mxu1 %v440_v55  ;;  %644 = vmatmul.f32.gmra.mxu2 %v439_v54 }
  0xb2   : > { %585 = vmatmul.f32.gmra.mxu1 %v441_v56  ;;  %647 = vmatmul.f32.gmra.mxu2 %v440_v55 }
  0xba   : > { %588 = vmatmul.f32.gmra.mxu1 %v442_v57  ;;  %650 = vmatmul.f32.gmra.mxu2 %v441_v56 }
  0xc2   : > { %591 = vmatmul.f32.gmra.mxu1 %v443_v58  ;;  %653 = vmatmul.f32.gmra.mxu2 %v442_v57 }
  0xca   : > { %594 = vmatmul.f32.gmra.mxu1 %v444_v59  ;;  %656 = vmatmul.f32.gmra.mxu2 %v443_v58 }
  0xd2   : > { %597 = vmatmul.f32.gmra.mxu1 %v445_v60  ;;  %659 = vmatmul.f32.gmra.mxu2 %v444_v59 }
  0xda   : > { %600 = vmatmul.f32.gmra.mxu1 %v446_v61  ;;  %662 = vmatmul.f32.gmra.mxu2 %v445_v60  ;;  %v545_v60 = vperm.slane %v3590_v2, 1 }
  0xe2   : > { %603 = vmatmul.f32.gmra.mxu1 %v447_v62  ;;  %665 = vmatmul.f32.gmra.mxu2 %v446_v61 }
  0xea   : > { %606 = vmatmul.f32.gmra.mxu1 %v448_v63  ;;  %668 = vmatmul.f32.gmra.mxu2 %v447_v62 }
  0xf2   : > { %609 = vmatmul.f32.gmra.mxu1 %v449_v1  ;;  %671 = vmatmul.f32.gmra.mxu2 %v448_v63 }
  0xf7   : > { %v565_v4 = vpop.f32.mrf.mxu1 }
  0xf8   : > { %v3596_v5 = vadd.f32 %v565_v4, %v3593_v3  ;;  %v537_v7 = vpop.f32.mrf.mxu0 }
  0xf9   : > { %v3603_v8 = vadd.f32 %v3600_v6, %v537_v7 }
  0xfa   : > { %801 = vrot.lane.b32.xlu1 %v3596_v5, %s3332_s10  ;;  %674 = vmatmul.f32.gmra.mxu2 %v449_v1 }
  0xff   : > { %v568_v9 = vpop.f32.mrf.mxu1 }
 0x100   : > { %v3608_v11 = vadd.f32 %v568_v9, %v3593_v3  ;;  %v540_v51 = vpop.f32.mrf.mxu0 }
 0x101   : > { %v3743_v52 = vadd.f32 %v3600_v6, %v540_v51 }
 0x102   : > { %797 = vrot.lane.b32.xlu1 %v3603_v8, %s3332_s10 }
 0x105   : > { %v3632_v19 = vpop.f32.mrf.mxu2 }
 0x107   : > { %v571_v10 = vpop.f32.mrf.mxu1 }
 0x108   : > { %v3613_v13 = vadd.f32 %v571_v10, %v3593_v3 }
 0x10a   : > { %803 = vrot.lane.b32.xlu1 %v3608_v11, %s3332_s10 }
 0x10d   : > { %v3639_v22 = vpop.f32.mrf.mxu2 }
 0x10f   : > { %v574_v12 = vpop.f32.mrf.mxu1 }
 0x110   : > { %v3618_v15 = vadd.f32 %v574_v12, %v3593_v3 }
 0x112   : > { %805 = vrot.lane.b32.xlu1 %v3613_v13, %s3332_s10 }
 0x115   : > { %v3646_v25 = vpop.f32.mrf.mxu2 }
 0x117   : > { %v577_v14 = vpop.f32.mrf.mxu1 }
 0x118   : > { %v3623_v17 = vadd.f32 %v577_v14, %v3593_v3 }
 0x11a   : > { %807 = vrot.lane.b32.xlu1 %v3618_v15, %s3332_s10 }
 0x11d   : > { %v3655_v28 = vpop.f32.mrf.mxu2 }
 0x11f   : > { %v580_v16 = vpop.f32.mrf.mxu1 }
 0x120   : > { %v3626_v18 = vadd.f32 %v580_v16, %v3593_v3 }
 0x122   : > { %811 = vrot.lane.b32.xlu0 %v3626_v18, %s3332_s10  ;;  %809 = vrot.lane.b32.xlu1 %v3623_v17, %s3332_s10 }
 0x125   : > { %v3662_v31 = vpop.f32.mrf.mxu2 }
 0x127   : > { %v583_v20 = vpop.f32.mrf.mxu1 }
 0x128   : > { %v3635_v21 = vadd.f32 %v583_v20, %v3593_v3 }
 0x12a   : > { %813 = vrot.lane.b32.xlu1 %v3635_v21, %s3332_s10 }
 0x12d   : > { %v3671_v34 = vpop.f32.mrf.mxu2 }
 0x12f   : > { %v586_v23 = vpop.f32.mrf.mxu1 }
 0x130   : > { %v3642_v24 = vadd.f32 %v586_v23, %v3593_v3 }
 0x132   : > { %815 = vrot.lane.b32.xlu2 %v3642_v24, %s3332_s10 }
 0x135   : > { %v3682_v37 = vpop.f32.mrf.mxu2 }
 0x136   : > { %v3817_v20 = vadd.f32 %v3682_v37, %v545_v60  ;;  %v3831_v37 = vadd.f32 %v3646_v25, %v545_v60 }
 0x137   : > { %v589_v26 = vpop.f32.mrf.mxu1 }
 0x138   : > { %v3649_v27 = vadd.f32 %v589_v26, %v3593_v3  ;;  %v646_v26 = vadd.f32 %v3671_v34, %v545_v60  ;;  %v3838_v34 = vadd.f32 %v3632_v19, %v545_v60 }
 0x13a   : > { %1017 = vrot.lane.b32.xlu0 %v3649_v27, %s3333_s4  ;;  %817 = vrot.lane.b32.xlu1 %v3649_v27, %s3332_s10 }
 0x13d   : > { %v3691_v41 = vpop.f32.mrf.mxu2 }
 0x13e   : > { %v3809_v12 = vadd.f32 %v3691_v41, %v545_v60 }
 0x13f   : > { %v592_v29 = vpop.f32.mrf.mxu1 }
 0x140   : > { %v3658_v30 = vadd.f32 %v592_v29, %v3593_v3 }
 0x142   : > { %819 = vrot.lane.b32.xlu2 %v3658_v30, %s3332_s10 }
 0x145   : > { %v3703_v45 = vpop.f32.mrf.mxu2 }
 0x146   : > { %v655_v14 = vadd.f32 %v3703_v45, %v545_v60 }
 0x147   : > { %v595_v32 = vpop.f32.mrf.mxu1 }
 0x148   : > { %v3665_v33 = vadd.f32 %v595_v32, %v3593_v3  ;;  %v3825_v32 = vadd.f32 %v3655_v28, %v545_v60 }
 0x14a   : > { %1019 = vrot.lane.b32.xlu2 %v3658_v30, %s3333_s4  ;;  %821 = vrot.lane.b32.xlu1 %v3665_v33, %s3332_s10 }
 0x14d   : > { %v657_v48 = vpop.f32.mrf.mxu2 }
 0x14e   : > { %v658_v10 = vadd.f32 %v657_v48, %v545_v60 }
 0x14f   : > { %v598_v35 = vpop.f32.mrf.mxu1 }
 0x150   : > { %v3674_v36 = vadd.f32 %v598_v35, %v3593_v3  ;;  %v3820_v23 = vpack.i.bf16 %v655_v14, %v658_v10  ;;  %v643_v35 = vadd.f32 %v3662_v31, %v545_v60 }
 0x152   : > { %1023 = vrot.lane.b32.xlu2 %v3674_v36, %s3333_s4  ;;  %823 = vrot.lane.b32.xlu0 %v3674_v36, %s3332_s10  ;;  %v3853_v45 = vpack.i.bf16 %v643_v35, %v646_v26 }
 0x153   : > { %1021 = vrot.lane.b32.xlu1 %v3665_v33, %s3333_s4 }
 0x155   : > { %v660_v49 = vpop.f32.mrf.mxu2 }
 0x156   : > { %v661_v6 = vadd.f32 %v660_v49, %v545_v60 }
 0x157   : > { %v601_v38 = vpop.f32.mrf.mxu1 }
 0x158   : > { %v3685_v39 = vadd.f32 %v601_v38, %v3593_v3 }
 0x15a   : > { %825 = vrot.lane.b32.xlu2 %v3685_v39, %s3332_s10  ;;  %1025 = vrot.lane.b32.xlu0 %v3685_v39, %s3333_s4 }
 0x15d   : > { %v663_v53 = vpop.f32.mrf.mxu2 }
 0x15e   : > { %v664_v7 = vadd.f32 %v663_v53, %v545_v60 }
 0x15f   : > { %v604_v40 = vpop.f32.mrf.mxu1 }
 0x160   : > { %v3694_v42 = vadd.f32 %v604_v40, %v3593_v3  ;;  %v3804_v9 = vpack.i.bf16 %v661_v6, %v664_v7  ;;  %v3834_v40 = vadd.f32 %v3639_v22, %v545_v60 }
 0x162   : > { %827 = vrot.lane.b32.xlu2 %v3694_v42, %s3332_s10  ;;  %1011 = vrot.lane.b32.xlu0 %v3626_v18, %s3333_s4 }
 0x165   : > { %v666_v55 = vpop.f32.mrf.mxu2 }
 0x166   : > { %v667_v62 = vadd.f32 %v666_v55, %v545_v60 }
 0x167   : > { %v607_v43 = vpop.f32.mrf.mxu1 }
 0x168   : > { %v3701_v44 = vadd.f32 %v607_v43, %v3593_v3 }
 0x16a   : > { %1027 = vrot.lane.b32.xlu2 %v3694_v42, %s3333_s4  ;;  %1005 = vrot.lane.b32.xlu0 %v3613_v13, %s3333_s4 }
 0x16b   : > { %829 = vrot.lane.b32.xlu1 %v3701_v44, %s3332_s10 }
 0x16c   : > { %v3732_v50 = vpop.permute.xlu1 %801 }
 0x16d   : > { %v669_v57 = vpop.f32.mrf.mxu2 }
 0x16e   : > { %v670_v63 = vadd.f32 %v669_v57, %v545_v60 }
 0x16f   : > { %v610_v46 = vpop.f32.mrf.mxu1 }
 0x170   : > { %v3712_v47 = vadd.f32 %v610_v46, %v3593_v3  ;;  %v3794_v2 = vpack.i.bf16 %v667_v62, %v670_v63 }
 0x172   : > { %2429 = vmatpush.xpose.msk.msra.mxu3 %vm678_vm0, %v3712_v47  ;;  %1013 = vrot.lane.b32.xlu2 %v3635_v21, %s3333_s4 }
 0x173   : > { %1001 = vrot.lane.b32.xlu0 %v3596_v5, %s3333_s4  ;;  %1029 = vrot.lane.b32.xlu1 %v3701_v44, %s3333_s4 }
 0x174   : > { %v3745_v54 = vpop.permute.xlu1 %797 }
 0x175   : > { %v672_v59 = vpop.f32.mrf.mxu2 }
 0x176   : > { %2430 = vmatpush.xpose.msk.msra.mxu3 %vm678_vm0, %v3701_v44  ;;  %v673_v1 = vadd.f32 %v672_v59, %v545_v60 }
 0x17a   : > { %2431 = vmatpush.xpose.msk.msra.mxu3 %vm678_vm0, %v3694_v42  ;;  %1007 = vrot.lane.b32.xlu2 %v3618_v15, %s3333_s4 }
 0x17b   : > { %831 = vrot.lane.b32.xlu1 %v3712_v47, %s3332_s10 }
 0x17c   : > { %v3759_v56 = vpop.permute.xlu1 %803 }
 0x17d   : > { %v675_v0 = vpop.f32.mrf.mxu2 }
 0x17e   : > { %2432 = vmatpush.xpose.msk.msra.mxu3 %vm678_vm0, %v3685_v39  ;;  %v676_v3 = vadd.f32 %v675_v0, %v545_v60 }
 0x180   : > { %774 = vmatpush.msrb.mxu0 %v676_v3  ;;  %v3845_v25 = vpack.i.bf16 %v673_v1, %v676_v3 }
 0x182   : > { %2433 = vmatpush.xpose.msk.msra.mxu3 %vm678_vm0, %v3674_v36  ;;  %1003 = vrot.lane.b32.xlu2 %v3608_v11, %s3333_s4 }
 0x183   : > { %1015 = vrot.lane.b32.xlu1 %v3642_v24, %s3333_s4  ;;  %775 = vmatpush.msrb.mxu0 %v673_v1 }
 0x184   : > { %v3771_v58 = vpop.permute.xlu1 %805 }
 0x185   : > { %776 = vmatpush.msrb.mxu0 %v670_v63 }
 0x186   : > { %2434 = vmatpush.xpose.msk.msra.mxu3 %vm678_vm0, %v3665_v33 }
 0x187   : > { %777 = vmatpush.msrb.mxu0 %v667_v62 }
 0x189   : > { %778 = vmatpush.msrb.mxu0 %v664_v7 }
 0x18a   : > { %2435 = vmatpush.xpose.msk.msra.mxu3 %vm678_vm0, %v3658_v30  ;;  %999 = vrot.lane.b32.xlu2 %v3743_v52, %s3333_s4 }
 0x18b   : > { %1009 = vrot.lane.b32.xlu1 %v3623_v17, %s3333_s4  ;;  %779 = vmatpush.msrb.mxu0 %v661_v6 }
 0x18c   : > { %v3784_v61 = vpop.permute.xlu1 %807  ;;  %v816_v29 = vpop.permute.xlu2 %815 }
 0x18d   : > { %780 = vmatpush.msrb.mxu0 %v658_v10 }
 0x18e   : > { %2436 = vmatpush.xpose.msk.msra.mxu3 %vm678_vm0, %v3649_v27 }
 0x18f   : > { %781 = vmatpush.msrb.mxu0 %v655_v14 }
 0x191   : > { %782 = vmatpush.msrb.mxu0 %v3809_v12 }
 0x192   : > { %2437 = vmatpush.xpose.msk.msra.mxu3 %vm678_vm0, %v3642_v24  ;;  %1213 = vrot.lane.b32.xlu2 %v3701_v44, %s3334_s6 }
 0x193   : > { %799 = vrot.lane.b32.xlu1 %v3743_v52, %s3332_s10  ;;  %783 = vmatpush.msrb.mxu0 %v3817_v20 }
 0x194   : > { %v3796_v4 = vpop.permute.xlu1 %809  ;;  %v812_v49 = vpop.permute.xlu0 %811 }
 0x195   : > { %784 = vmatpush.msrb.mxu0 %v646_v26 }
 0x196   : > { %2438 = vmatpush.xpose.msk.msra.mxu3 %vm678_vm0, %v3635_v21 }
 0x197   : > { %785 = vmatpush.msrb.mxu0 %v643_v35 }
 0x199   : > { %786 = vmatpush.msrb.mxu0 %v3825_v32 }
 0x19a   : > { %2439 = vmatpush.xpose.msk.msra.mxu3 %vm678_vm0, %v3626_v18  ;;  %1209 = vrot.lane.b32.xlu2 %v3685_v39, %s3334_s6 }
 0x19b   : > { %997 = vrot.lane.b32.xlu1 %v3603_v8, %s3333_s4  ;;  %787 = vmatpush.msrb.mxu0 %v3831_v37 }
 0x19c   : > { %v3812_v16 = vpop.permute.xlu1 %813  ;;  %v820_v28 = vpop.permute.xlu2 %819 }
 0x19d   : > { %788 = vmatpush.msrb.mxu0 %v3834_v40 }
 0x19e   : > { %2440 = vmatpush.xpose.msk.msra.mxu3 %vm678_vm0, %v3623_v17 }
 0x19f   : > { %789 = vmatpush.msrb.mxu0 %v3838_v34 }
 0x1a2   : > { %2441 = vmatpush.xpose.msk.msra.mxu3 %vm678_vm0, %v3618_v15  ;;  %1207 = vrot.lane.b32.xlu2 %v3674_v36, %s3334_s6 }
 0x1a3   : > { %1211 = vrot.lane.b32.xlu1 %v3694_v42, %s3334_s6 }
 0x1a4   : > { %v3847_v22 = vpop.permute.xlu2 %1019 }
 0x1a6   : > { %2442 = vmatpush.xpose.msk.msra.mxu3 %vm678_vm0, %v3613_v13 }
 0x1aa   : > { %2443 = vmatpush.xpose.msk.msra.mxu3 %vm678_vm0, %v3608_v11  ;;  %1205 = vrot.lane.b32.xlu2 %v3665_v33, %s3334_s6 }
 0x1ab   : > { %1031 = vrot.lane.b32.xlu1 %v3712_v47, %s3333_s4 }
 0x1ac   : > { %v818_v38 = vpop.permute.xlu1 %817  ;;  %v1024_v41 = vpop.permute.xlu2 %1023 }
 0x1ad   : > { %v1018_v55 = vpop.permute.xlu0 %1017 }
 0x1ae   : > { %2444 = vmatpush.xpose.msk.msra.mxu3 %vm678_vm0, %v3596_v5 }
 0x1b1   : > { %2445 = vmatmul.msk.f32.vlgmr.msra.gmra.mxu3 %vm678_vm0, %v3603_v8 }
 0x1b2   : > { %1203 = vrot.lane.b32.xlu2 %v3658_v30, %s3334_s6 }
 0x1b3   : > { %2688 = vrot.lane.b32.xlu1 %v3794_v2, %s3332_s10 }
 0x1b4   : > { %v826_v48 = vpop.permute.xlu2 %825 }
 0x1b9   : > { %2446 = vmatmul.msk.f32.gmra.mxu3 %vm678_vm0, %v3743_v52 }
 0x1bb   : > { %2693 = vrot.lane.b32.xlu1 %v3804_v9, %s3332_s10 }
 0x1bc   : > { %v822_v31 = vpop.permute.xlu1 %821  ;;  %v828_v53 = vpop.permute.xlu2 %827 }
 0x1c3   : > { %2698 = vrot.lane.b32.xlu1 %v3820_v23, %s3332_s10 }
 0x1c4   : > { %v1028_v59 = vpop.permute.xlu2 %1027  ;;  %v824_v60 = vpop.permute.xlu0 %823 }
 0x1c5   : > { %v1022_v19 = vpop.permute.xlu1 %1021 }
 0x1cb   : > { %1215 = vrot.lane.b32.xlu1 %v3712_v47, %s3334_s6 }
 0x1cc   : > { %v1014_v63 = vpop.permute.xlu2 %1013 }
 0x1d3   : > { %2703 = vrot.lane.b32.xlu1 %v3845_v25, %s3332_s10 }
 0x1d4   : > { %v1008_v3 = vpop.permute.xlu2 %1007 }
 0x1db   : > { %1199 = vrot.lane.b32.xlu1 %v3642_v24, %s3334_s6 }
 0x1dc   : > { %v1004_v7 = vpop.permute.xlu2 %1003 }
 0x1dd   : > { %v830_v43 = vpop.permute.xlu1 %829 }
 0x1e3   : > { %2713 = vrot.lane.b32.xlu1 %v3853_v45, %s3332_s10 }
 0x1e4   : > { %v1000_v14 = vpop.permute.xlu2 %999 }
 0x1e5   : > { %v1030_v46 = vpop.permute.xlu1 %1029 }
 0x1eb   : > { %1193 = vrot.lane.b32.xlu1 %v3623_v17, %s3334_s6 }
 0x1ed   : > { %v832_v51 = vpop.permute.xlu1 %831 }
 0x1ee   : > { %2447 = vmatpush.xpose.msk.msra.mxu0 %vm678_vm0, %v832_v51 }
 0x1f2   : > { %2448 = vmatpush.xpose.msk.msra.mxu0 %vm678_vm0, %v830_v43 }
 0x1f3   : > { %1395 = vrot.lane.b32.xlu1 %v3694_v42, %s3335_s25 }
 0x1f5   : > { %v1016_v57 = vpop.permute.xlu1 %1015 }
 0x1f6   : > { %2449 = vmatpush.xpose.msk.msra.mxu0 %vm678_vm0, %v828_v53 }
 0x1fa   : > { %2450 = vmatpush.xpose.msk.msra.mxu0 %vm678_vm0, %v826_v48 }
 0x1fb   : > { %1393 = vrot.lane.b32.xlu1 %v3685_v39, %s3335_s25 }
 0x1fd   : > { %v1010_v62 = vpop.permute.xlu1 %1009 }
 0x1fe   : > { %2451 = vmatpush.xpose.msk.msra.mxu0 %vm678_vm0, %v824_v60 }
 0x202   : > { %2452 = vmatpush.xpose.msk.msra.mxu0 %vm678_vm0, %v822_v31 }
 0x203   : > { %2728 = vrot.lane.b32.xlu1 %v3845_v25, %s3333_s4 }
 0x205   : > { %v3871_v0 = vpop.permute.xlu1 %799 }
 0x206   : > { %2453 = vmatpush.xpose.msk.msra.mxu0 %vm678_vm0, %v820_v28 }
 0x20a   : > { %2454 = vmatpush.xpose.msk.msra.mxu0 %vm678_vm0, %v818_v38 }
 0x20b   : > { %2733 = vrot.lane.b32.xlu1 %v3794_v2, %s3333_s4 }
 0x20d   : > { %v998_v1 = vpop.permute.xlu1 %997 }
 0x20e   : > { %2455 = vmatpush.xpose.msk.msra.mxu0 %vm678_vm0, %v816_v29 }
 0x212   : > { %2456 = vmatpush.xpose.msk.msra.mxu0 %vm678_vm0, %v3812_v16 }
 0x213   : > { %1387 = vrot.lane.b32.xlu1 %v3658_v30, %s3335_s25 }
 0x215   : > { %v1212_v6 = vpop.permute.xlu1 %1211 }
 0x216   : > { %2457 = vmatpush.xpose.msk.msra.mxu0 %vm678_vm0, %v812_v49 }
 0x21a   : > { %2458 = vmatpush.xpose.msk.msra.mxu0 %vm678_vm0, %v3796_v4  ;;  %v1026_v4 = vpop.permute.xlu0 %1025 }
 0x21b   : > { %1377 = vrot.lane.b32.xlu1 %v3623_v17, %s3335_s25 }
 0x21d   : > { %v1032_v10 = vpop.permute.xlu1 %1031 }
 0x21e   : > { %2459 = vmatpush.xpose.msk.msra.mxu0 %vm678_vm0, %v3784_v61  ;;  %2465 = vmatpush.xpose.msk.msrb.mxu1 %vm678_vm0, %v1032_v10 }
 0x222   : > { %2460 = vmatpush.xpose.msk.msra.mxu0 %vm678_vm0, %v3771_v58  ;;  %2466 = vmatpush.xpose.msk.msrb.mxu1 %vm678_vm0, %v1030_v46  ;;  %v1214_v58 = vpop.permute.xlu2 %1213  ;;  %v1012_v28 = vpop.permute.xlu0 %1011 }
 0x223   : > { %1373 = vrot.lane.b32.xlu1 %v3613_v13, %s3335_s25 }
 0x225   : > { %v2689_v16 = vpop.permute.xlu1 %2688 }
 0x226   : > { %2461 = vmatpush.xpose.msk.msra.mxu0 %vm678_vm0, %v3759_v56  ;;  %2467 = vmatpush.xpose.msk.msrb.mxu1 %vm678_vm0, %v1028_v59  ;;  %v2690_v49 = vunpack.i.l.bf16 %v2689_v16  ;;  %v2691_v51 = vunpack.i.h.bf16 %v2689_v16 }
 0x22a   : > { %2462 = vmatpush.xpose.msk.msra.mxu0 %vm678_vm0, %v3732_v50  ;;  %2468 = vmatpush.xpose.msk.msrb.mxu1 %vm678_vm0, %v1026_v4  ;;  %v1210_v50 = vpop.permute.xlu2 %1209 }
 0x22b   : > { %1183 = vrot.lane.b32.xlu1 %v3743_v52, %s3334_s6 }
 0x22d   : > { %v2694_v61 = vpop.permute.xlu1 %2693 }
 0x22e   : > { %2469 = vmatpush.xpose.msk.msrb.mxu1 %vm678_vm0, %v1024_v41  ;;  %v2695_v53 = vunpack.i.l.bf16 %v2694_v61 }
 0x232   : > { %2470 = vmatpush.xpose.msk.msrb.mxu1 %vm678_vm0, %v1022_v19  ;;  %v1208_v38 = vpop.permute.xlu2 %1207  ;;  %v1006_v19 = vpop.permute.xlu0 %1005 }
 0x233   : > { %1369 = vrot.lane.b32.xlu1 %v3596_v5, %s3335_s25 }
 0x234   : > { %v750_v56 = vpop.f32.mrf.mxu3 }
 0x235   : > { %v2699_v26 = vpop.permute.xlu1 %2698  ;;  %756 = vmax.xlane.f32.xlu0 %v750_v56 }
 0x236   : > { %2471 = vmatpush.xpose.msk.msrb.mxu1 %vm678_vm0, %v3847_v22  ;;  %v3920_v22 = vpack.i.bf16 %v3817_v20, %v3809_v12  ;;  %v3936_v12 = vpack.i.bf16 %v3831_v37, %v3825_v32  ;;  %v2696_v32 = vunpack.i.h.bf16 %v2694_v61  ;;  %v2700_v37 = vunpack.i.l.bf16 %v2699_v26 }
 0x237   : > { %v2701_v60 = vunpack.i.h.bf16 %v2699_v26 }
 0x23a   : > { %2472 = vmatpush.xpose.msk.msrb.mxu1 %vm678_vm0, %v1018_v55  ;;  %v1206_v31 = vpop.permute.xlu2 %1205  ;;  %v1002_v43 = vpop.permute.xlu0 %1001 }
 0x23c   : > { %v753_v29 = vpop.f32.mrf.mxu3 }
 0x23d   : > { %v1216_v35 = vpop.permute.xlu1 %1215  ;;  %758 = vmax.xlane.f32.xlu0 %v753_v29 }
 0x23e   : > { %2473 = vmatpush.xpose.msk.msrb.mxu1 %vm678_vm0, %v1016_v57  ;;  %2483 = vmatpush.xpose.msk.msrb.mxu2 %vm678_vm0, %v1216_v35 }
 0x242   : > { %2474 = vmatpush.xpose.msk.msrb.mxu1 %vm678_vm0, %v1014_v63  ;;  %2484 = vmatpush.xpose.msk.msrb.mxu2 %vm678_vm0, %v1214_v58  ;;  %v1204_v41 = vpop.permute.xlu2 %1203 }
 0x245   : > { %v2704_v20 = vpop.permute.xlu1 %2703 }
 0x246   : > { %2475 = vmatpush.xpose.msk.msrb.mxu1 %vm678_vm0, %v1012_v28  ;;  %2485 = vmatpush.xpose.msk.msrb.mxu2 %vm678_vm0, %v1212_v6  ;;  %v2705_v46 = vunpack.i.l.bf16 %v2704_v20  ;;  %v2706_v48 = vunpack.i.h.bf16 %v2704_v20  ;;  %v3956_v28 = vpack.i.bf16 %v3838_v34, %v3834_v40 }
 0x248   : > { %974 = vmatpush.msrb.mxu3 %v2705_v46 }
 0x24a   : > { %2476 = vmatpush.xpose.msk.msrb.mxu1 %vm678_vm0, %v1010_v62  ;;  %2486 = vmatpush.xpose.msk.msrb.mxu2 %vm678_vm0, %v1210_v50 }
 0x24b   : > { %975 = vmatpush.msrb.mxu3 %v2706_v48 }
 0x24d   : > { %976 = vmatpush.msrb.mxu3 %v2690_v49 }
 0x24e   : > { %2477 = vmatpush.xpose.msk.msrb.mxu1 %vm678_vm0, %v1008_v3  ;;  %2487 = vmatpush.xpose.msk.msrb.mxu2 %vm678_vm0, %v1208_v38 }
 0x24f   : > { %977 = vmatpush.msrb.mxu3 %v2691_v51 }
 0x251   : > { %2708 = vrot.lane.b32.xlu0 %v3920_v22, %s3332_s10  ;;  %978 = vmatpush.msrb.mxu3 %v2695_v53 }
 0x252   : > { %2478 = vmatpush.xpose.msk.msrb.mxu1 %vm678_vm0, %v1006_v19  ;;  %2488 = vmatpush.xpose.msk.msrb.mxu2 %vm678_vm0, %v1206_v31 }
 0x253   : > { %979 = vmatpush.msrb.mxu3 %v2696_v32 }
 0x255   : > { %980 = vmatpush.msrb.mxu3 %v2700_v37 }
 0x256   : > { %2479 = vmatpush.xpose.msk.msrb.mxu1 %vm678_vm0, %v1004_v7  ;;  %2489 = vmatpush.xpose.msk.msrb.mxu2 %vm678_vm0, %v1204_v41  ;;  %v1200_v7 = vpop.permute.xlu1 %1199 }
 0x257   : > { %981 = vmatpush.msrb.mxu3 %v2701_v60 }
 0x259   : > { %1197 = vrot.lane.b32.xlu0 %v3635_v21, %s3334_s6 }
 0x25a   : > { %2480 = vmatpush.xpose.msk.msrb.mxu1 %vm678_vm0, %v1002_v43 }
 0x25d   : > { %2481 = vmatmul.msk.f32.vlgmr.msrb.gmra.mxu1 %vm678_vm0, %v998_v1 }
 0x25e   : > { %v2714_v4 = vpop.permute.xlu1 %2713 }
 0x25f   : > { %v2715_v58 = vunpack.i.l.bf16 %v2714_v4  ;;  %v2716_v61 = vunpack.i.h.bf16 %v2714_v4 }
 0x261   : > { %2718 = vrot.lane.b32.xlu0 %v3936_v12, %s3332_s10 }
 0x265   : > { %2482 = vmatmul.msk.f32.gmra.mxu1 %vm678_vm0, %v1000_v14 }
 0x266   : > { %v1194_v48 = vpop.permute.xlu1 %1193 }
 0x269   : > { %1195 = vrot.lane.b32.xlu0 %v3626_v18, %s3334_s6 }
 0x26e   : > { %v3999_v49 = vpop.permute.xlu1 %1395 }
 0x276   : > { %v4003_v51 = vpop.permute.xlu1 %1393 }
 0x2a8   : > { %v757_v55 = vpop.xlane.xlu0 %756 }
 0x2a9   : > { %v760_v57 = vsub.f32 %v750_v56, %v757_v55 }
 0x2ab   : > { %v762_v59 = vmul.f32 1.442695, %v760_v57 }
 0x2ad   : > { %2988 = vpow2.f32 %v762_v59 }
 0x2b0   : > { %v759_v62 = vpop.xlane.xlu0 %758 }
 0x2b1   : > { %v761_v63 = vsub.f32 %v753_v29, %v759_v62 }
 0x2b3   : > { %v2989_v1 = vpop.eup %2988  ;;  %v764_v3 = vmul.f32 1.442695, %v761_v63 }
 0x2b4   : > { %766 = vadd.xlane.f32.xlu2 %v2989_v1 }
 0x2b5   : > { %2990 = vpow2.f32 %v764_v3 }
 0x2bb   : > { %v2991_v6 = vpop.eup %2990 }
 0x2bc   : > { %768 = vadd.xlane.f32.xlu0 %v2991_v6 }
 0x2c3   : > { %v2709_v10 = vpop.permute.xlu0 %2708 }
 0x2c4   : > { %v2710_v14 = vunpack.i.l.bf16 %v2709_v10  ;;  %v2711_v16 = vunpack.i.h.bf16 %v2709_v10 }
 0x2c6   : > { %982 = vmatpush.msrb.mxu3 %v2710_v14 }
 0x2c8   : > { %983 = vmatpush.msrb.mxu3 %v2711_v16 }
 0x2ca   : > { %984 = vmatpush.msrb.mxu3 %v2715_v58 }
 0x2cb   : > { %v1198_v56 = vpop.permute.xlu0 %1197 }
 0x2cc   : > { %1201 = vrot.lane.b32.xlu2 %v3649_v27, %s3334_s6  ;;  %985 = vmatpush.msrb.mxu3 %v2716_v61 }
 0x2d3   : > { %v2719_v26 = vpop.permute.xlu0 %2718 }
 0x2d4   : > { %v2720_v50 = vunpack.i.l.bf16 %v2719_v26  ;;  %v2721_v29 = vunpack.i.h.bf16 %v2719_v26 }
 0x2d6   : > { %986 = vmatpush.msrb.mxu3 %v2720_v50 }
 0x2d8   : > { %987 = vmatpush.msrb.mxu3 %v2721_v29 }
 0x2da   : > { %v1086_v35 = vpop.f32.mrf.mxu1 }
 0x2db   : > { %v1196_v40 = vpop.permute.xlu0 %1195 }
 0x2e2   : > { %v3945_v38 = vpop.f32.mrf.mxu1 }
 0x2e3   : > { %1094 = vmax.xlane.f32.xlu0 %v3945_v38 }
 0x2f5   : > { %1092 = vmax.xlane.f32.xlu2 %v1086_v35 }
 0x2f7   : > { %1397 = vrot.lane.b32.xlu0 %v3701_v44, %s3335_s25 }
 0x2ff   : > { %1181 = vrot.lane.b32.xlu0 %v3603_v8, %s3334_s6 }
 0x307   : > { %1389 = vrot.lane.b32.xlu0 %v3665_v33, %s3335_s25 }
 0x30d   : > { %2723 = vrot.lane.b32.xlu2 %v3956_v28, %s3332_s10 }
 0x30f   : > { %2743 = vrot.lane.b32.xlu0 %v3820_v23, %s3333_s4 }
 0x315   : > { %1399 = vrot.lane.b32.xlu2 %v3712_v47, %s3335_s25 }
 0x317   : > { %2748 = vrot.lane.b32.xlu0 %v3920_v22, %s3333_s4 }
 0x31d   : > { %1191 = vrot.lane.b32.xlu2 %v3618_v15, %s3334_s6 }
 0x31f   : > { %2753 = vrot.lane.b32.xlu0 %v3853_v45, %s3333_s4 }
 0x325   : > { %1189 = vrot.lane.b32.xlu2 %v3613_v13, %s3334_s6 }
 0x327   : > { %1375 = vrot.lane.b32.xlu0 %v3618_v15, %s3335_s25  ;;  %v767_v34 = vpop.xlane.xlu2 %766 }
 0x328   : > { %2992 = vrcp.f32 %v767_v34 }
 0x32d   : > { %1187 = vrot.lane.b32.xlu2 %v3608_v11, %s3334_s6 }
 0x32e   : > { %v2993_v31 = vpop.eup %2992 }
 0x32f   : > { %1371 = vrot.lane.b32.xlu0 %v3608_v11, %s3335_s25  ;;  %v1202_v19 = vpop.permute.xlu2 %1201  ;;  %v769_v41 = vpop.xlane.xlu0 %768  ;;  %v772_v43 = vmul.f32 %v2993_v31, %v2989_v1 }
 0x330   : > { %2994 = vrcp.f32 %v769_v41  ;;  %2490 = vmatpush.xpose.msk.msrb.mxu2 %vm678_vm0, %v1202_v19 }
 0x331   : > { %790 = vmatmul.f32.vlgmr.msrb.gmra.mxu0 %v772_v43 }
 0x334   : > { %2491 = vmatpush.xpose.msk.msrb.mxu2 %vm678_vm0, %v1200_v7 }
 0x335   : > { %1185 = vrot.lane.b32.xlu2 %v3596_v5, %s3334_s6 }
 0x336   : > { %v2995_v20 = vpop.eup %2994 }
 0x337   : > { %1367 = vrot.lane.b32.xlu0 %v3743_v52, %s3335_s25  ;;  %v773_v46 = vmul.f32 %v2995_v20, %v2991_v6 }
 0x338   : > { %2492 = vmatpush.xpose.msk.msrb.mxu2 %vm678_vm0, %v1198_v56 }
 0x339   : > { %793 = vmatmul.f32.gmra.mxu0 %v773_v46 }
 0x33c   : > { %2493 = vmatpush.xpose.msk.msrb.mxu2 %vm678_vm0, %v1196_v40 }
 0x33d   : > { %1391 = vrot.lane.b32.xlu2 %v3674_v36, %s3335_s25 }
 0x340   : > { %2494 = vmatpush.xpose.msk.msrb.mxu2 %vm678_vm0, %v1194_v48 }
 0x341   : > { %2463 = vmatmul.msk.f32.vlgmr.msra.gmra.mxu0 %vm678_vm0, %v3745_v54 }
 0x345   : > { %2738 = vrot.lane.b32.xlu2 %v3804_v9, %s3333_s4 }
 0x349   : > { %2464 = vmatmul.msk.f32.gmra.mxu0 %vm678_vm0, %v3871_v0  ;;  %v2729_v0 = vpop.permute.xlu1 %2728 }
 0x34a   : > { %v2730_v60 = vunpack.i.l.bf16 %v2729_v0  ;;  %v2731_v62 = vunpack.i.h.bf16 %v2729_v0 }
 0x34d   : > { %1385 = vrot.lane.b32.xlu2 %v3649_v27, %s3335_s25 }
 0x351   : > { %v2734_v63 = vpop.permute.xlu1 %2733 }
 0x352   : > { %v2735_v1 = vunpack.i.l.bf16 %v2734_v63  ;;  %v2736_v7 = vunpack.i.h.bf16 %v2734_v63 }
 0x355   : > { %1383 = vrot.lane.b32.xlu2 %v3642_v24, %s3335_s25 }
 0x356   : > { %v1095_v3 = vpop.xlane.xlu0 %1094 }
 0x357   : > { %v1097_v50 = vsub.f32 %v3945_v38, %v1095_v3 }
 0x359   : > { %v4021_v16 = vpop.permute.xlu1 %1387  ;;  %v1100_v40 = vmul.f32 1.442695, %v1097_v50 }
 0x35d   : > { %1381 = vrot.lane.b32.xlu2 %v3635_v21, %s3335_s25 }
 0x361   : > { %v4024_v61 = vpop.permute.xlu1 %1377 }
 0x365   : > { %2758 = vrot.lane.b32.xlu2 %v3936_v12, %s3333_s4 }
 0x368   : > { %v1093_v54 = vpop.xlane.xlu2 %1092 }
 0x369   : > { %v1096_v53 = vsub.f32 %v1086_v35, %v1093_v54  ;;  %v4018_v10 = vpop.permute.xlu0 %1397  ;;  %v4030_v35 = vpop.permute.xlu1 %1373 }
 0x36b   : > { %v1098_v32 = vmul.f32 1.442695, %v1096_v53 }
 0x36d   : > { %2996 = vpow2.f32 %v1098_v32  ;;  %1379 = vrot.lane.b32.xlu2 %v3626_v18, %s3335_s25 }
 0x36e   : > { %2998 = vpow2.f32 %v1100_v40 }
 0x370   : > { %v2724_v37 = vpop.permute.xlu2 %2723 }
 0x371   : > { %v2725_v55 = vunpack.i.l.bf16 %v2724_v37  ;;  %v2726_v59 = vunpack.i.h.bf16 %v2724_v37  ;;  %v1182_v58 = vpop.permute.xlu0 %1181  ;;  %v1184_v19 = vpop.permute.xlu1 %1183 }
 0x373   : > { %v4009_v57 = vpop.eup %2996  ;;  %988 = vmatpush.msrb.mxu3 %v2725_v55 }
 0x374   : > { %1102 = vadd.xlane.f32.xlu0 %v4009_v57  ;;  %v4037_v41 = vpop.eup %2998 }
 0x375   : > { %2763 = vrot.lane.b32.xlu2 %v3956_v28, %s3333_s4  ;;  %989 = vmatpush.msrb.mxu3 %v2726_v59 }
 0x377   : > { %1158 = vmatpush.msra.mxu3 %v2730_v60 }
 0x378   : > { %v4014_v6 = vpop.permute.xlu2 %1399 }
 0x379   : > { %1159 = vmatpush.msra.mxu3 %v2731_v62  ;;  %v4027_v26 = vpop.permute.xlu0 %1389 }
 0x37b   : > { %1160 = vmatpush.msra.mxu3 %v2735_v1 }
 0x37d   : > { %1161 = vmatpush.msra.mxu3 %v2736_v7  ;;  %1365 = vrot.lane.b32.xlu2 %v3603_v8, %s3335_s25 }
 0x380   : > { %v1192_v14 = vpop.permute.xlu2 %1191 }
 0x381   : > { %2495 = vmatpush.xpose.msk.msrb.mxu2 %vm678_vm0, %v1192_v14  ;;  %v2744_v34 = vpop.permute.xlu0 %2743 }
 0x382   : > { %v2745_v48 = vunpack.i.l.bf16 %v2744_v34  ;;  %v2746_v53 = vunpack.i.h.bf16 %v2744_v34 }
 0x388   : > { %v1190_v4 = vpop.permute.xlu2 %1189 }
 0x389   : > { %2496 = vmatpush.xpose.msk.msrb.mxu2 %vm678_vm0, %v1190_v4  ;;  %v2749_v38 = vpop.permute.xlu0 %2748 }
 0x38a   : > { %v2750_v0 = vunpack.i.l.bf16 %v2749_v38  ;;  %v2751_v55 = vunpack.i.h.bf16 %v2749_v38 }
 0x390   : > { %v1188_v56 = vpop.permute.xlu2 %1187 }
 0x391   : > { %2497 = vmatpush.xpose.msk.msrb.mxu2 %vm678_vm0, %v1188_v56  ;;  %v2754_v37 = vpop.permute.xlu0 %2753 }
 0x392   : > { %v2755_v59 = vunpack.i.l.bf16 %v2754_v37  ;;  %v2756_v62 = vunpack.i.h.bf16 %v2754_v37 }
 0x398   : > { %v1186_v29 = vpop.permute.xlu2 %1185 }
 0x399   : > { %2498 = vmatpush.xpose.msk.msrb.mxu2 %vm678_vm0, %v1186_v29  ;;  %v4080_v34 = vpop.permute.xlu0 %1375 }
 0x39c   : > { %2499 = vmatmul.msk.f32.vlgmr.msrb.gmra.mxu2 %vm678_vm0, %v1182_v58 }
 0x3a0   : > { %v4034_v31 = vpop.permute.xlu2 %1391 }
 0x3a1   : > { %v4087_v38 = vpop.permute.xlu0 %1371 }
 0x3a4   : > { %2500 = vmatmul.msk.f32.gmra.mxu2 %vm678_vm0, %v1184_v19 }
 0x3a6   : > { %1104 = vadd.xlane.f32.xlu2 %v4037_v41 }
 0x3a8   : > { %v2739_v43 = vpop.permute.xlu2 %2738 }
 0x3a9   : > { %v2740_v20 = vunpack.i.l.bf16 %v2739_v43  ;;  %v2741_v46 = vunpack.i.h.bf16 %v2739_v43  ;;  %v4091_v43 = vpop.permute.xlu0 %1367 }
 0x3ab   : > { %1162 = vmatpush.msra.mxu3 %v2740_v20 }
 0x3ad   : > { %1163 = vmatpush.msra.mxu3 %v2741_v46 }
 0x3ae   : > { %v4040_v54 = vpop.f32.mrf.mxu0 }
 0x3af   : > { %1164 = vmatpush.msra.mxu3 %v2745_v48 }
 0x3b0   : > { %v4042_v32 = vpop.permute.xlu2 %1385 }
 0x3b1   : > { %1165 = vmatpush.msra.mxu3 %v2746_v53 }
 0x3b3   : > { %1166 = vmatpush.msra.mxu3 %v2750_v0 }
 0x3b5   : > { %1167 = vmatpush.msra.mxu3 %v2751_v55 }
 0x3b6   : > { %v4044_v60 = vpop.f32.mrf.mxu0 }
 0x3b7   : > { %1168 = vmatpush.msra.mxu3 %v2755_v59 }
 0x3b8   : > { %v4046_v63 = vpop.permute.xlu2 %1383 }
 0x3b9   : > { %1169 = vmatpush.msra.mxu3 %v2756_v62 }
 0x3be   : > { %v886_v1 = vpop.f32.mrf.mxu0  ;;  %2778 = vrot.lane.b32.xlu2 %v3804_v9, %s3334_s6 }
 0x3bf   : > { %892 = vmax.xlane.f32.xlu0 %v886_v1 }
 0x3c0   : > { %v4050_v3 = vpop.permute.xlu2 %1381 }
 0x3c6   : > { %2783 = vrot.lane.b32.xlu2 %v3820_v23, %s3334_s6  ;;  %v889_v40 = vpop.f32.mrf.mxu0 }
 0x3c8   : > { %v2759_v7 = vpop.permute.xlu2 %2758 }
 0x3c9   : > { %v2760_v14 = vunpack.i.l.bf16 %v2759_v7  ;;  %v2761_v4 = vunpack.i.h.bf16 %v2759_v7 }
 0x3cb   : > { %1170 = vmatpush.msra.mxu3 %v2760_v14 }
 0x3cd   : > { %1171 = vmatpush.msra.mxu3 %v2761_v4 }
 0x3ce   : > { %2788 = vrot.lane.b32.xlu2 %v3920_v22, %s3334_s6 }
 0x3d0   : > { %v4056_v58 = vpop.permute.xlu2 %1379 }
 0x3d3   : > { %2768 = vrot.lane.b32.xlu0 %v3845_v25, %s3334_s6 }
 0x3d6   : > { %1579 = vrot.lane.b32.xlu2 %v3694_v42, %s3336_s22 }
 0x3d8   : > { %v2764_v56 = vpop.permute.xlu2 %2763 }
 0x3d9   : > { %v2765_v50 = vunpack.i.l.bf16 %v2764_v56  ;;  %v2766_v29 = vunpack.i.h.bf16 %v2764_v56 }
 0x3db   : > { %1172 = vmatpush.msra.mxu3 %v2765_v50 }
 0x3dd   : > { %1173 = vmatpush.msra.mxu3 %v2766_v29 }
 0x3de   : > { %2803 = vrot.lane.b32.xlu2 %v3956_v28, %s3334_s6 }
 0x3e0   : > { %v4123_v7 = vpop.permute.xlu2 %1365 }
 0x3e6   : > { %1575 = vrot.lane.b32.xlu2 %v3674_v36, %s3336_s22 }
 0x3e7   : > { %v4095_v20 = vpop.xlane.xlu0 %1102 }
 0x3ee   : > { %1767 = vrot.lane.b32.xlu2 %v3712_v47, %s3337_s3 }
 0x3f6   : > { %1573 = vrot.lane.b32.xlu2 %v3665_v33, %s3336_s22 }
 0x3fd   : > { %894 = vmax.xlane.f32.xlu0 %v889_v40 }
 0x3fe   : > { %1949 = vrot.lane.b32.xlu2 %v3701_v44, %s3338_s23 }
 0x406   : > { %1763 = vrot.lane.b32.xlu2 %v3694_v42, %s3337_s3 }
 0x40e   : > { %1761 = vrot.lane.b32.xlu2 %v3685_v39, %s3337_s3 }
 0x411   : > { %2773 = vrot.lane.b32.xlu0 %v3794_v2, %s3334_s6 }
 0x416   : > { %1567 = vrot.lane.b32.xlu2 %v3642_v24, %s3336_s22 }
 0x41e   : > { %2813 = vrot.lane.b32.xlu2 %v3794_v2, %s3335_s25 }
 0x41f   : > { %v4084_v19 = vpop.f32.mrf.mxu2 }
 0x420   : > { %1276 = vmax.xlane.f32.xlu1 %v4084_v19 }
 0x426   : > { %1941 = vrot.lane.b32.xlu2 %v3665_v33, %s3338_s23 }
 0x427   : > { %v4101_v46 = vpop.f32.mrf.mxu2 }
 0x42e   : > { %1755 = vrot.lane.b32.xlu2 %v3658_v30, %s3337_s3 }
 0x432   : > { %v893_v48 = vpop.xlane.xlu0 %892 }
 0x433   : > { %v896_v55 = vsub.f32 %v886_v1, %v893_v48  ;;  %v4127_v1 = vpop.xlane.xlu2 %1104 }
 0x435   : > { %v898_v59 = vmul.f32 1.442695, %v896_v55 }
 0x436   : > { %1561 = vrot.lane.b32.xlu2 %v3623_v17, %s3336_s22 }
 0x437   : > { %3000 = vpow2.f32 %v898_v59 }
 0x439   : > { %1583 = vrot.lane.b32.xlu1 %v3712_v47, %s3336_s22 }
 0x43b   : > { %1278 = vmax.xlane.f32.xlu0 %v4101_v46 }
 0x43d   : > { %v4120_v62 = vpop.eup %3000 }
 0x43e   : > { %1937 = vrot.lane.b32.xlu2 %v3649_v27, %s3338_s23 }
 0x445   : > { %v2769_v53 = vpop.permute.xlu0 %2768 }
 0x446   : > { %v2770_v0 = vunpack.i.l.bf16 %v2769_v53  ;;  %1559 = vrot.lane.b32.xlu2 %v3618_v15, %s3336_s22  ;;  %v2771_v37 = vunpack.i.h.bf16 %v2769_v53 }
 0x448   : > { %1342 = vmatpush.msrb.mxu0 %v2770_v0 }
 0x44a   : > { %1343 = vmatpush.msrb.mxu0 %v2771_v37 }
 0x44e   : > { %1935 = vrot.lane.b32.xlu2 %v3642_v24, %s3338_s23 }
 0x44f   : > { %2793 = vrot.lane.b32.xlu0 %v3853_v45, %s3334_s6 }
 0x456   : > { %1557 = vrot.lane.b32.xlu2 %v3613_v13, %s3336_s22 }
 0x457   : > { %2798 = vrot.lane.b32.xlu0 %v3936_v12, %s3334_s6 }
 0x45e   : > { %1745 = vrot.lane.b32.xlu2 %v3623_v17, %s3337_s3 }
 0x45f   : > { %1951 = vrot.lane.b32.xlu0 %v3712_v47, %s3338_s23  ;;  %v2779_v47 = vpop.permute.xlu2 %2778 }
 0x460   : > { %v2781_v0 = vunpack.i.h.bf16 %v2779_v47 }
 0x463   : > { %902 = vadd.xlane.f32.xlu1 %v4120_v62 }
 0x467   : > { %1947 = vrot.lane.b32.xlu0 %v3694_v42, %s3338_s23  ;;  %v2784_v42 = vpop.permute.xlu2 %2783 }
 0x468   : > { %v2785_v37 = vunpack.i.l.bf16 %v2784_v42  ;;  %v2786_v59 = vunpack.i.h.bf16 %v2784_v42 }
 0x46f   : > { %1945 = vrot.lane.b32.xlu0 %v3685_v39, %s3338_s23  ;;  %v2789_v55 = vpop.permute.xlu2 %2788 }
 0x470   : > { %v895_v14 = vpop.xlane.xlu0 %894 }
 0x471   : > { %v897_v4 = vsub.f32 %v889_v40, %v895_v14  ;;  %v2780_v40 = vunpack.i.l.bf16 %v2779_v47  ;;  %v2790_v14 = vunpack.i.l.bf16 %v2789_v55 }
 0x473   : > { %v900_v56 = vmul.f32 1.442695, %v897_v4  ;;  %v2791_v4 = vunpack.i.h.bf16 %v2789_v55 }
 0x475   : > { %3002 = vpow2.f32 %v900_v56  ;;  %v4146_v56 = vpop.permute.xlu1 %1369 }
 0x477   : > { %1759 = vrot.lane.b32.xlu0 %v3674_v36, %s3337_s3 }
 0x47b   : > { %v4133_v50 = vpop.eup %3002 }
 0x47c   : > { %904 = vadd.xlane.f32.xlu1 %v4133_v50 }
 0x47f   : > { %1565 = vrot.lane.b32.xlu0 %v3635_v21, %s3336_s22 }
 0x483   : > { %v2774_v29 = vpop.permute.xlu0 %2773 }
 0x484   : > { %v2775_v48 = vunpack.i.l.bf16 %v2774_v29  ;;  %v2776_v53 = vunpack.i.h.bf16 %v2774_v29 }
 0x486   : > { %1344 = vmatpush.msrb.mxu0 %v2775_v48 }
 0x487   : > { %2818 = vrot.lane.b32.xlu0 %v3804_v9, %s3335_s25 }
 0x488   : > { %1345 = vmatpush.msrb.mxu0 %v2776_v53 }
 0x48a   : > { %1346 = vmatpush.msrb.mxu0 %v2780_v40 }
 0x48c   : > { %1347 = vmatpush.msrb.mxu0 %v2781_v0 }
 0x48e   : > { %1348 = vmatpush.msrb.mxu0 %v2785_v37 }
 0x48f   : > { %1939 = vrot.lane.b32.xlu0 %v3658_v30, %s3338_s23 }
 0x490   : > { %1349 = vmatpush.msrb.mxu0 %v2786_v59 }
 0x492   : > { %1350 = vmatpush.msrb.mxu0 %v2790_v14 }
 0x493   : > { %v1277_v47 = vpop.xlane.xlu1 %1276 }
 0x494   : > { %1351 = vmatpush.msrb.mxu0 %v2791_v4  ;;  %v1280_v29 = vsub.f32 %v4084_v19, %v1277_v47 }
 0x495   : > { %1581 = vrot.lane.b32.xlu1 %v3701_v44, %s3336_s22 }
 0x496   : > { %v1282_v48 = vmul.f32 1.442695, %v1280_v29 }
 0x497   : > { %1753 = vrot.lane.b32.xlu0 %v3649_v27, %s3337_s3 }
 0x498   : > { %3004 = vpow2.f32 %v1282_v48 }
 0x49e   : > { %v4160_v40 = vpop.eup %3004 }
 0x49f   : > { %2828 = vrot.lane.b32.xlu0 %v3920_v22, %s3335_s25 }
 0x4a7   : > { %1751 = vrot.lane.b32.xlu0 %v3642_v24, %s3337_s3  ;;  %v4165_v24 = vpop.permute.xlu2 %1579 }
 0x4ab   : > { %v1584_v42 = vpop.permute.xlu1 %1583 }
 0x4ac   : > { %2519 = vmatpush.xpose.msk.msra.mxu1 %vm678_vm0, %v1584_v42 }
 0x4ae   : > { %v4158_v53 = vpop.xlane.xlu0 %1278 }
 0x4af   : > { %2833 = vrot.lane.b32.xlu0 %v3853_v45, %s3335_s25  ;;  %v2804_v14 = vpop.permute.xlu2 %2803 }
 0x4b0   : > { %v2805_v47 = vunpack.i.l.bf16 %v2804_v14 }
 0x4b7   : > { %1749 = vrot.lane.b32.xlu0 %v3635_v21, %s3337_s3 }
 0x4bf   : > { %1933 = vrot.lane.b32.xlu0 %v3635_v21, %s3338_s23  ;;  %1286 = vadd.xlane.f32.xlu1 %v4160_v40  ;;  %v2806_v21 = vunpack.i.h.bf16 %v2804_v14 }
 0x4c1   : > { %v2794_v0 = vpop.permute.xlu0 %2793 }
 0x4c2   : > { %v2795_v37 = vunpack.i.l.bf16 %v2794_v0  ;;  %v2796_v55 = vunpack.i.h.bf16 %v2794_v0 }
 0x4c4   : > { %1352 = vmatpush.msrb.mxu0 %v2795_v37 }
 0x4c6   : > { %1353 = vmatpush.msrb.mxu0 %v2796_v55 }
 0x4c7   : > { %1555 = vrot.lane.b32.xlu0 %v3608_v11, %s3336_s22 }
 0x4c9   : > { %v2799_v19 = vpop.permute.xlu0 %2798 }
 0x4ca   : > { %v2800_v59 = vunpack.i.l.bf16 %v2799_v19  ;;  %v2801_v4 = vunpack.i.h.bf16 %v2799_v19 }
 0x4cc   : > { %1354 = vmatpush.msrb.mxu0 %v2800_v59 }
 0x4ce   : > { %1355 = vmatpush.msrb.mxu0 %v2801_v4 }
 0x4cf   : > { %1747 = vrot.lane.b32.xlu0 %v3626_v18, %s3337_s3 }
 0x4d0   : > { %1356 = vmatpush.msrb.mxu0 %v2805_v47 }
 0x4d1   : > { %v1952_v0 = vpop.permute.xlu0 %1951 }
 0x4d2   : > { %1357 = vmatpush.msrb.mxu0 %v2806_v21 }
 0x4d6   : > { %v903_v42 = vpop.xlane.xlu1 %902 }
 0x4d7   : > { %3006 = vrcp.f32 %v903_v42  ;;  %1931 = vrot.lane.b32.xlu0 %v3626_v18, %s3338_s23 }
 0x4d8   : > { %1577 = vrot.lane.b32.xlu1 %v3685_v39, %s3336_s22 }
 0x4d9   : > { %v1948_v39 = vpop.permute.xlu0 %1947 }
 0x4dd   : > { %v3007_v29 = vpop.eup %3006 }
 0x4de   : > { %v908_v48 = vmul.f32 %v3007_v29, %v4120_v62 }
 0x4df   : > { %1553 = vrot.lane.b32.xlu0 %v3596_v5, %s3336_s22 }
 0x4e0   : > { %1765 = vrot.lane.b32.xlu1 %v3701_v44, %s3337_s3  ;;  %990 = vmatmul.f32.vlgmr.msrb.gmra.mxu3 %v908_v48 }
 0x4e1   : > { %2501 = vmatpush.xpose.msk.msrb.mxu3 %vm678_vm0, %v4014_v6 }
 0x4e5   : > { %2502 = vmatpush.xpose.msk.msrb.mxu3 %vm678_vm0, %v4018_v10 }
 0x4e7   : > { %1929 = vrot.lane.b32.xlu0 %v3623_v17, %s3338_s23 }
 0x4e8   : > { %1571 = vrot.lane.b32.xlu1 %v3658_v30, %s3336_s22 }
 0x4e9   : > { %2503 = vmatpush.xpose.msk.msrb.mxu3 %vm678_vm0, %v3999_v49  ;;  %v1946_v49 = vpop.permute.xlu0 %1945 }
 0x4ed   : > { %2504 = vmatpush.xpose.msk.msrb.mxu3 %vm678_vm0, %v4003_v51  ;;  %v1576_v51 = vpop.permute.xlu2 %1575 }
 0x4ef   : > { %1549 = vrot.lane.b32.xlu0 %v3603_v8, %s3336_s22  ;;  %v905_v44 = vpop.xlane.xlu1 %904 }
 0x4f0   : > { %3008 = vrcp.f32 %v905_v44  ;;  %1569 = vrot.lane.b32.xlu1 %v3649_v27, %s3336_s22 }
 0x4f1   : > { %2505 = vmatpush.xpose.msk.msrb.mxu3 %vm678_vm0, %v4034_v31  ;;  %3010 = vrcp.f32 %v4095_v20  ;;  %v4214_v10 = vpop.permute.xlu0 %1759 }
 0x4f2   : > { %3012 = vrcp.f32 %v4127_v1 }
 0x4f5   : > { %2506 = vmatpush.xpose.msk.msrb.mxu3 %vm678_vm0, %v4027_v26 }
 0x4f6   : > { %v3009_v17 = vpop.eup %3008 }
 0x4f7   : > { %v909_v30 = vmul.f32 %v3009_v17, %v4133_v50  ;;  %v3011_v27 = vpop.eup %3010 }
 0x4f8   : > { %2808 = vrot.lane.b32.xlu1 %v3845_v25, %s3335_s25  ;;  %v1108_v6 = vmul.f32 %v3011_v27, %v4009_v57  ;;  %v4224_v57 = vpop.permute.xlu2 %1767 }
 0x4f9   : > { %2507 = vmatpush.xpose.msk.msrb.mxu3 %vm678_vm0, %v4021_v16  ;;  %v3013_v16 = vpop.eup %3012  ;;  %v1566_v31 = vpop.permute.xlu0 %1565 }
 0x4fa   : > { %993 = vmatmul.f32.gmra.mxu3 %v909_v30 }
 0x4fd   : > { %2508 = vmatpush.xpose.msk.msrb.mxu3 %vm678_vm0, %v4042_v32 }
 0x500   : > { %1943 = vrot.lane.b32.xlu1 %v3674_v36, %s3338_s23  ;;  %v1109_v36 = vmul.f32 %v3013_v16, %v4037_v41 }
 0x501   : > { %2509 = vmatpush.xpose.msk.msrb.mxu3 %vm678_vm0, %v4046_v63  ;;  %v4236_v41 = vpop.permute.xlu0 %2818 }
 0x502   : > { %1174 = vmatmul.f32.vlgmr.msra.gmra.mxu3 %v1108_v6  ;;  %v2820_v17 = vunpack.i.l.bf16 %v4236_v41  ;;  %v2821_v30 = vunpack.i.h.bf16 %v4236_v41 }
 0x505   : > { %2510 = vmatpush.xpose.msk.msrb.mxu3 %vm678_vm0, %v4050_v3 }
 0x507   : > { %v1582_v26 = vpop.permute.xlu1 %1581 }
 0x508   : > { %1757 = vrot.lane.b32.xlu1 %v3665_v33, %s3337_s3  ;;  %2520 = vmatpush.xpose.msk.msra.mxu1 %vm678_vm0, %v1582_v26  ;;  %v1574_v33 = vpop.permute.xlu2 %1573 }
 0x509   : > { %2511 = vmatpush.xpose.msk.msrb.mxu3 %vm678_vm0, %v4056_v58  ;;  %v1281_v58 = vsub.f32 %v4101_v46, %v4158_v53 }
 0x50a   : > { %1177 = vmatmul.f32.gmra.mxu3 %v1109_v36 }
 0x50c   : > { %2521 = vmatpush.xpose.msk.msra.mxu1 %vm678_vm0, %v4165_v24 }
 0x50d   : > { %2512 = vmatpush.xpose.msk.msrb.mxu3 %vm678_vm0, %v4024_v61 }
 0x510   : > { %1563 = vrot.lane.b32.xlu1 %v3626_v18, %s3336_s22  ;;  %v1950_v61 = vpop.permute.xlu2 %1949  ;;  %v4247_v18 = vpop.permute.xlu0 %1939 }
 0x511   : > { %2513 = vmatpush.xpose.msk.msrb.mxu3 %vm678_vm0, %v4080_v34 }
 0x515   : > { %2514 = vmatpush.xpose.msk.msrb.mxu3 %vm678_vm0, %v4030_v35 }
 0x518   : > { %2823 = vrot.lane.b32.xlu1 %v3820_v23, %s3335_s25  ;;  %v4251_v35 = vpop.permute.xlu2 %1763  ;;  %v4256_v32 = vpop.permute.xlu0 %1753 }
 0x519   : > { %2515 = vmatpush.xpose.msk.msrb.mxu3 %vm678_vm0, %v4087_v38  ;;  %v1284_v38 = vmul.f32 1.442695, %v1281_v58 }
 0x51d   : > { %2516 = vmatpush.xpose.msk.msrb.mxu3 %vm678_vm0, %v4146_v56 }
 0x520   : > { %2517 = vmatmul.msk.f32.vlgmr.msrb.gmra.mxu3 %vm678_vm0, %v4123_v7  ;;  %v4258_v63 = vpop.permute.xlu2 %1761  ;;  %v4262_v34 = vpop.permute.xlu0 %2828 }
 0x521   : > { %2555 = vmatpush.xpose.msk.msra.mxu3 %vm678_vm0, %v1952_v0 }
 0x525   : > { %2556 = vmatpush.xpose.msk.msra.mxu3 %vm678_vm0, %v1950_v61 }
 0x528   : > { %2518 = vmatmul.msk.f32.gmra.mxu3 %vm678_vm0, %v4091_v43  ;;  %v1568_v7 = vpop.permute.xlu2 %1567  ;;  %v4265_v43 = vpop.permute.xlu0 %1751 }
 0x529   : > { %2557 = vmatpush.xpose.msk.msra.mxu3 %vm678_vm0, %v1948_v39 }
 0x52d   : > { %2558 = vmatpush.xpose.msk.msra.mxu3 %vm678_vm0, %v1946_v49 }
 0x530   : > { %v2814_v50 = vpop.permute.xlu2 %2813  ;;  %v4270_v56 = vpop.permute.xlu0 %2833 }
 0x531   : > { %v2815_v48 = vunpack.i.l.bf16 %v2814_v50  ;;  %v2816_v0 = vunpack.i.h.bf16 %v2814_v50  ;;  %v2831_v50 = vunpack.i.h.bf16 %v4262_v34 }
 0x532   : > { %v1287_v3 = vpop.xlane.xlu1 %1286 }
 0x533   : > { %3014 = vrcp.f32 %v1287_v3 }
 0x534   : > { %3016 = vpow2.f32 %v1284_v38 }
 0x538   : > { %v1942_v53 = vpop.permute.xlu2 %1941 }
 0x539   : > { %v3015_v20 = vpop.eup %3014 }
 0x53a   : > { %v1292_v62 = vmul.f32 %v3015_v20, %v4160_v40  ;;  %v4267_v1 = vpop.eup %3016  ;;  %v4276_v40 = vpop.permute.xlu0 %1749 }
 0x53c   : > { %1358 = vmatmul.f32.vlgmr.msrb.gmra.mxu0 %v1292_v62  ;;  %v2830_v62 = vunpack.i.l.bf16 %v4262_v34 }
 0x540   : > { %v4279_v37 = vpop.permute.xlu2 %1755 }
 0x542   : > { %1288 = vadd.xlane.f32.xlu1 %v4267_v1  ;;  %v1934_v19 = vpop.permute.xlu0 %1933 }
 0x548   : > { %v1562_v14 = vpop.permute.xlu2 %1561 }
 0x54a   : > { %v1578_v46 = vpop.permute.xlu1 %1577  ;;  %v1556_v4 = vpop.permute.xlu0 %1555 }
 0x54b   : > { %2522 = vmatpush.xpose.msk.msra.mxu1 %vm678_vm0, %v1578_v46  ;;  %v2835_v46 = vunpack.i.l.bf16 %v4270_v56 }
 0x54f   : > { %2523 = vmatpush.xpose.msk.msra.mxu1 %vm678_vm0, %v1576_v51 }
 0x550   : > { %v1938_v29 = vpop.permute.xlu2 %1937 }
 0x552   : > { %v4274_v24 = vpop.permute.xlu1 %1765  ;;  %v4289_v39 = vpop.permute.xlu0 %1747 }
 0x553   : > { %2524 = vmatpush.xpose.msk.msra.mxu1 %vm678_vm0, %v1574_v33 }
 0x558   : > { %v1560_v27 = vpop.permute.xlu2 %1559 }
 0x55a   : > { %v1572_v55 = vpop.permute.xlu1 %1571  ;;  %v1932_v6 = vpop.permute.xlu0 %1931 }
 0x55b   : > { %2525 = vmatpush.xpose.msk.msra.mxu1 %vm678_vm0, %v1572_v55  ;;  %2838 = vrot.lane.b32.xlu1 %v3936_v12, %s3335_s25 }
 0x560   : > { %v1936_v36 = vpop.permute.xlu2 %1935 }
 0x562   : > { %v1570_v59 = vpop.permute.xlu1 %1569  ;;  %v1554_v33 = vpop.permute.xlu0 %1553 }
 0x563   : > { %2526 = vmatpush.xpose.msk.msra.mxu1 %vm678_vm0, %v1570_v59  ;;  %2843 = vrot.lane.b32.xlu1 %v3956_v28, %s3335_s25  ;;  %v4294_v49 = vpop.f32.mrf.mxu3 }
 0x567   : > { %2527 = vmatpush.xpose.msk.msra.mxu1 %vm678_vm0, %v1568_v7 }
 0x568   : > { %v1558_v38 = vpop.permute.xlu2 %1557 }
 0x56a   : > { %v2809_v47 = vpop.permute.xlu1 %2808  ;;  %v1930_v7 = vpop.permute.xlu0 %1929 }
 0x56b   : > { %v2810_v21 = vunpack.i.l.bf16 %v2809_v47  ;;  %2528 = vmatpush.xpose.msk.msra.mxu1 %vm678_vm0, %v1566_v31  ;;  %v2811_v42 = vunpack.i.h.bf16 %v2809_v47 }
 0x56d   : > { %1526 = vmatpush.msra.mxu0 %v2810_v21 }
 0x56f   : > { %1527 = vmatpush.msra.mxu0 %v2811_v42 }
 0x571   : > { %1528 = vmatpush.msra.mxu0 %v2815_v48 }
 0x572   : > { %v1944_v44 = vpop.permute.xlu1 %1943  ;;  %v1550_v55 = vpop.permute.xlu0 %1549 }
 0x573   : > { %1529 = vmatpush.msra.mxu0 %v2816_v0  ;;  %2559 = vmatpush.xpose.msk.msra.mxu3 %vm678_vm0, %v1944_v44 }
 0x575   : > { %1530 = vmatpush.msra.mxu0 %v2820_v17 }
 0x577   : > { %1531 = vmatpush.msra.mxu0 %v2821_v30  ;;  %2560 = vmatpush.xpose.msk.msra.mxu3 %vm678_vm0, %v1942_v53  ;;  %v2836_v53 = vunpack.i.h.bf16 %v4270_v56 }
 0x57a   : > { %v4297_v51 = vpop.permute.xlu1 %1757 }
 0x57b   : > { %2561 = vmatpush.xpose.msk.msra.mxu3 %vm678_vm0, %v4247_v18 }
 0x57d   : > { %v4301_v16 = vpop.f32.mrf.mxu3 }
 0x57e   : > { %v2967_v26 = vpack.i.bf16 %v4301_v16, %v4294_v49 }
 0x57f   : > { %2562 = vmatpush.xpose.msk.msra.mxu3 %vm678_vm0, %v1938_v29 }
 0x582   : > { %v1564_v31 = vpop.permute.xlu1 %1563 }
 0x583   : > { %2529 = vmatpush.xpose.msk.msra.mxu1 %vm678_vm0, %v1564_v31  ;;  %2563 = vmatpush.xpose.msk.msra.mxu3 %vm678_vm0, %v1936_v36 }
 0x585   : > { %v4308_v41 = vpop.f32.mrf.mxu3 }
 0x587   : > { %2530 = vmatpush.xpose.msk.msra.mxu1 %vm678_vm0, %v1562_v14  ;;  %2564 = vmatpush.xpose.msk.msra.mxu3 %vm678_vm0, %v1934_v19 }
 0x58a   : > { %v2824_v61 = vpop.permute.xlu1 %2823 }
 0x58b   : > { %v2825_v18 = vunpack.i.l.bf16 %v2824_v61  ;;  %2531 = vmatpush.xpose.msk.msra.mxu1 %vm678_vm0, %v1560_v27  ;;  %2565 = vmatpush.xpose.msk.msra.mxu3 %vm678_vm0, %v1932_v6  ;;  %v2826_v3 = vunpack.i.h.bf16 %v2824_v61 }
 0x58d   : > { %v4314_v58 = vpop.f32.mrf.mxu3  ;;  %1532 = vmatpush.msra.mxu0 %v2825_v18 }
 0x58e   : > { %v2972_v20 = vpack.i.bf16 %v4314_v58, %v4308_v41 }
 0x58f   : > { %1533 = vmatpush.msra.mxu0 %v2826_v3  ;;  %2532 = vmatpush.xpose.msk.msra.mxu1 %vm678_vm0, %v1558_v38 }
 0x590   : > { %2566 = vmatpush.xpose.msk.msra.mxu3 %vm678_vm0, %v1930_v7 }
 0x591   : > { %1534 = vmatpush.msra.mxu0 %v2830_v62 }
 0x593   : > { %1535 = vmatpush.msra.mxu0 %v2831_v50  ;;  %2533 = vmatpush.xpose.msk.msra.mxu1 %vm678_vm0, %v1556_v4 }
 0x595   : > { %1536 = vmatpush.msra.mxu0 %v2835_v46 }
 0x597   : > { %1537 = vmatpush.msra.mxu0 %v2836_v53  ;;  %2534 = vmatpush.xpose.msk.msra.mxu1 %vm678_vm0, %v1554_v33 }
 0x59a   : > { %2535 = vmatmul.msk.f32.vlgmr.msra.gmra.mxu1 %vm678_vm0, %v1550_v55 }
 0x5a3   : > { %v1454_v19 = vpop.f32.mrf.mxu3 }
 0x5a4   : > { %1460 = vmax.xlane.f32.xlu2 %v1454_v19 }
 0x5ab   : > { %v1457_v59 = vpop.f32.mrf.mxu3 }
 0x5ac   : > { %1462 = vmax.xlane.f32.xlu0 %v1457_v59 }
 0x5b5   : > { %v1289_v34 = vpop.xlane.xlu1 %1288 }
 0x5b6   : > { %3018 = vrcp.f32 %v1289_v34 }
 0x5bc   : > { %v3019_v14 = vpop.eup %3018  ;;  %1927 = vrot.lane.b32.xlu2 %v3618_v15, %s3338_s23 }
 0x5bd   : > { %v1293_v4 = vmul.f32 %v3019_v14, %v4267_v1 }
 0x5bf   : > { %1361 = vmatmul.f32.gmra.mxu0 %v1293_v4 }
 0x5c0   : > { %1743 = vrot.lane.b32.xlu0 %v3618_v15, %s3337_s3 }
 0x5c4   : > { %1925 = vrot.lane.b32.xlu2 %v3613_v13, %s3338_s23 }
 0x5c8   : > { %1741 = vrot.lane.b32.xlu0 %v3613_v13, %s3337_s3 }
 0x5cc   : > { %1739 = vrot.lane.b32.xlu2 %v3608_v11, %s3337_s3 }
 0x5cd   : > { %v2839_v56 = vpop.permute.xlu1 %2838 }
 0x5ce   : > { %v2840_v47 = vunpack.i.l.bf16 %v2839_v56  ;;  %v2841_v21 = vunpack.i.h.bf16 %v2839_v56 }
 0x5d0   : > { %1551 = vrot.lane.b32.xlu0 %v3743_v52, %s3336_s22  ;;  %1538 = vmatpush.msra.mxu0 %v2840_v47 }
 0x5d2   : > { %1539 = vmatpush.msra.mxu0 %v2841_v21 }
 0x5d5   : > { %v2844_v1 = vpop.permute.xlu1 %2843 }
 0x5d6   : > { %v2845_v42 = vunpack.i.l.bf16 %v2844_v1  ;;  %v2846_v15 = vunpack.i.h.bf16 %v2844_v1 }
 0x5d8   : > { %1923 = vrot.lane.b32.xlu0 %v3608_v11, %s3338_s23  ;;  %1540 = vmatpush.msra.mxu0 %v2845_v42  ;;  %v1746_v11 = vpop.permute.xlu2 %1745 }
 0x5da   : > { %1541 = vmatpush.msra.mxu0 %v2846_v15 }
 0x5dc   : > { %2537 = vmatpush.xpose.msk.msrb.mxu0 %vm678_vm0, %v4224_v57 }
 0x5e0   : > { %2538 = vmatpush.xpose.msk.msrb.mxu0 %vm678_vm0, %v4274_v24  ;;  %1733 = vrot.lane.b32.xlu0 %v3603_v8, %s3337_s3 }
 0x5e4   : > { %2539 = vmatpush.xpose.msk.msrb.mxu0 %vm678_vm0, %v4251_v35 }
 0x5e8   : > { %2540 = vmatpush.xpose.msk.msrb.mxu0 %vm678_vm0, %v4258_v63  ;;  %1735 = vrot.lane.b32.xlu0 %v3743_v52, %s3337_s3 }
 0x5ec   : > { %2541 = vmatpush.xpose.msk.msrb.mxu0 %vm678_vm0, %v4214_v10 }
 0x5f0   : > { %2542 = vmatpush.xpose.msk.msrb.mxu0 %vm678_vm0, %v4297_v51 }
 0x5f4   : > { %2543 = vmatpush.xpose.msk.msrb.mxu0 %vm678_vm0, %v4279_v37 }
 0x5f8   : > { %2544 = vmatpush.xpose.msk.msrb.mxu0 %vm678_vm0, %v4256_v32 }
 0x5fc   : > { %2545 = vmatpush.xpose.msk.msrb.mxu0 %vm678_vm0, %v4265_v43 }
 0x600   : > { %2546 = vmatpush.xpose.msk.msrb.mxu0 %vm678_vm0, %v4276_v40 }
 0x604   : > { %2547 = vmatpush.xpose.msk.msrb.mxu0 %vm678_vm0, %v4289_v39 }
 0x608   : > { %2548 = vmatpush.xpose.msk.msrb.mxu0 %vm678_vm0, %v1746_v11 }
 0x617   : > { %v1461_v13 = vpop.xlane.xlu2 %1460  ;;  %v4369_v10 = vpop.f32.mrf.mxu1 }
 0x618   : > { %v1464_v57 = vsub.f32 %v1454_v19, %v1461_v13  ;;  %1644 = vmax.xlane.f32.xlu0 %v4369_v10 }
 0x61a   : > { %v1466_v35 = vmul.f32 1.442695, %v1464_v57 }
 0x61c   : > { %3020 = vpow2.f32 %v1466_v35 }
 0x61f   : > { %v1928_v32 = vpop.permute.xlu2 %1927  ;;  %v1463_v63 = vpop.xlane.xlu0 %1462 }
 0x620   : > { %v1465_v43 = vsub.f32 %v1457_v59, %v1463_v63  ;;  %2567 = vmatpush.xpose.msk.msra.mxu3 %vm678_vm0, %v1928_v32  ;;  %v4423_v59 = vpop.f32.mrf.mxu0 }
 0x622   : > { %v3021_v24 = vpop.eup %3020  ;;  %v1468_v40 = vmul.f32 1.442695, %v1465_v43 }
 0x623   : > { %1470 = vadd.xlane.f32.xlu2 %v3021_v24 }
 0x624   : > { %3022 = vpow2.f32 %v1468_v40 }
 0x627   : > { %v1926_v37 = vpop.permute.xlu2 %1925 }
 0x628   : > { %2568 = vmatpush.xpose.msk.msra.mxu3 %vm678_vm0, %v1926_v37 }
 0x62a   : > { %v3023_v29 = vpop.eup %3022 }
 0x62b   : > { %1472 = vadd.xlane.f32.xlu1 %v3023_v29 }
 0x62f   : > { %v1740_v39 = vpop.permute.xlu2 %1739 }
 0x632   : > { %v1744_v48 = vpop.permute.xlu0 %1743 }
 0x633   : > { %2549 = vmatpush.xpose.msk.msrb.mxu0 %vm678_vm0, %v1744_v48 }
 0x63a   : > { %v1742_v0 = vpop.permute.xlu0 %1741 }
 0x63b   : > { %1921 = vrot.lane.b32.xlu2 %v3596_v5, %s3338_s23  ;;  %2550 = vmatpush.xpose.msk.msrb.mxu0 %vm678_vm0, %v1742_v0 }
 0x63c   : > { %v4427_v34 = vpop.f32.mrf.mxu0 }
 0x63f   : > { %2551 = vmatpush.xpose.msk.msrb.mxu0 %vm678_vm0, %v1740_v39 }
 0x642   : > { %v1552_v44 = vpop.permute.xlu0 %1551 }
 0x643   : > { %1917 = vrot.lane.b32.xlu2 %v3603_v8, %s3338_s23  ;;  %2536 = vmatmul.msk.f32.gmra.mxu1 %vm678_vm0, %v1552_v44 }
 0x644   : > { %1737 = vrot.lane.b32.xlu1 %v3596_v5, %s3337_s3 }
 0x64a   : > { %v1924_v17 = vpop.permute.xlu0 %1923 }
 0x64b   : > { %1919 = vrot.lane.b32.xlu2 %v3743_v52, %s3338_s23  ;;  %2569 = vmatpush.xpose.msk.msra.mxu3 %vm678_vm0, %v1924_v17 }
 0x652   : > { %v1734_v18 = vpop.permute.xlu0 %1733 }
 0x653   : > { %2848 = vrot.lane.b32.xlu2 %v3845_v25, %s3336_s22 }
 0x65a   : > { %v1736_v50 = vpop.permute.xlu0 %1735 }
 0x65b   : > { %2863 = vrot.lane.b32.xlu2 %v3820_v23, %s3336_s22 }
 0x663   : > { %2878 = vrot.lane.b32.xlu2 %v3853_v45, %s3336_s22 }
 0x66b   : > { %2888 = vrot.lane.b32.xlu2 %v3845_v25, %s3338_s23 }
 0x673   : > { %2898 = vrot.lane.b32.xlu2 %v3804_v9, %s3337_s3 }
 0x67b   : > { %2908 = vrot.lane.b32.xlu2 %v3956_v28, %s3336_s22 }
 0x68b   : > { %v1645_v40 = vpop.xlane.xlu0 %1644 }
 0x696   : > { %v1471_v5 = vpop.xlane.xlu2 %1470 }
 0x697   : > { %3024 = vrcp.f32 %v1471_v5 }
 0x69d   : > { %v3025_v8 = vpop.eup %3024 }
 0x69e   : > { %v1922_v52 = vpop.permute.xlu2 %1921  ;;  %v1473_v30 = vpop.xlane.xlu1 %1472  ;;  %v1476_v27 = vmul.f32 %v3025_v8, %v3021_v24 }
 0x69f   : > { %3026 = vrcp.f32 %v1473_v30  ;;  %2570 = vmatpush.xpose.msk.msra.mxu3 %vm678_vm0, %v1922_v52 }
 0x6a0   : > { %1542 = vmatmul.f32.vlgmr.msra.gmra.mxu0 %v1476_v27 }
 0x6a5   : > { %v3027_v51 = vpop.eup %3026 }
 0x6a6   : > { %v1918_v6 = vpop.permute.xlu2 %1917  ;;  %v1477_v36 = vmul.f32 %v3027_v51, %v3023_v29 }
 0x6a7   : > { %2571 = vmatmul.msk.f32.vlgmr.msra.gmra.mxu3 %vm678_vm0, %v1918_v6 }
 0x6a8   : > { %1545 = vmatmul.f32.gmra.mxu0 %v1477_v36 }
 0x6ae   : > { %v1920_v31 = vpop.permute.xlu2 %1919 }
 0x6af   : > { %2572 = vmatmul.msk.f32.gmra.mxu3 %vm678_vm0, %v1920_v31 }
 0x6b6   : > { %v2849_v33 = vpop.permute.xlu2 %2848  ;;  %v1738_v61 = vpop.permute.xlu1 %1737 }
 0x6b7   : > { %v2850_v3 = vunpack.i.l.bf16 %v2849_v33  ;;  %2552 = vmatpush.xpose.msk.msrb.mxu0 %vm678_vm0, %v1738_v61  ;;  %v2851_v38 = vunpack.i.h.bf16 %v2849_v33 }
 0x6b9   : > { %1710 = vmatpush.msra.mxu2 %v2850_v3 }
 0x6ba   : > { %2553 = vmatmul.msk.f32.vlgmr.msrb.gmra.mxu0 %vm678_vm0, %v1734_v18 }
 0x6bb   : > { %1711 = vmatpush.msra.mxu2 %v2851_v38 }
 0x6be   : > { %v4404_v62 = vpop.permute.xlu2 %2863 }
 0x6bf   : > { %v2865_v3 = vunpack.i.l.bf16 %v4404_v62 }
 0x6c0   : > { %v1641_v7 = vpop.f32.mrf.mxu1 }
 0x6c1   : > { %1646 = vmax.xlane.f32.xlu1 %v1641_v7 }
 0x6c2   : > { %2554 = vmatmul.msk.f32.gmra.mxu0 %vm678_vm0, %v1736_v50 }
 0x6c6   : > { %v4407_v46 = vpop.permute.xlu2 %2878 }
 0x6ce   : > { %v2889_v53 = vpop.permute.xlu2 %2888 }
 0x6cf   : > { %v2890_v55 = vunpack.i.l.bf16 %v2889_v53  ;;  %v2891_v19 = vunpack.i.h.bf16 %v2889_v53 }
 0x6d1   : > { %2078 = vmatpush.msrb.mxu1 %v2890_v55 }
 0x6d3   : > { %2079 = vmatpush.msrb.mxu1 %v2891_v19 }
 0x6da   : > { %2853 = vrot.lane.b32.xlu1 %v3794_v2, %s3336_s22 }
 0x6e2   : > { %2868 = vrot.lane.b32.xlu1 %v3920_v22, %s3336_s22 }
 0x6ea   : > { %2883 = vrot.lane.b32.xlu1 %v3794_v2, %s3337_s3 }
 0x6f2   : > { %2893 = vrot.lane.b32.xlu1 %v3936_v12, %s3336_s22 }
 0x6fa   : > { %2903 = vrot.lane.b32.xlu1 %v3794_v2, %s3338_s23 }
 0x702   : > { %2913 = vrot.lane.b32.xlu1 %v3820_v23, %s3337_s3 }
 0x70a   : > { %2918 = vrot.lane.b32.xlu1 %v3804_v9, %s3338_s23 }
 0x712   : > { %2923 = vrot.lane.b32.xlu1 %v3920_v22, %s3337_s3 }
 0x71a   : > { %2933 = vrot.lane.b32.xlu1 %v3853_v45, %s3337_s3 }
 0x71d   : > { %v4431_v14 = vpop.f32.mrf.mxu0 }
 0x725   : > { %v4433_v4 = vpop.f32.mrf.mxu0 }
 0x726   : > { %v2982_v2 = vpack.i.bf16 %v4433_v4, %v4431_v14 }
 0x72a   : > { %v4437_v56 = vpop.f32.mrf.mxu3 }
 0x72b   : > { %2012 = vmax.xlane.f32.xlu0 %v4437_v56 }
 0x732   : > { %v4440_v47 = vpop.f32.mrf.mxu3 }
 0x733   : > { %2014 = vmax.xlane.f32.xlu0 %v4440_v47 }
 0x734   : > { %v1647_v21 = vpop.xlane.xlu1 %1646 }
 0x735   : > { %v1649_v1 = vsub.f32 %v1641_v7, %v1647_v21  ;;  %v2866_v7 = vunpack.i.h.bf16 %v4404_v62  ;;  %v2881_v62 = vunpack.i.h.bf16 %v4407_v46 }
 0x737   : > { %v1652_v42 = vmul.f32 1.442695, %v1649_v1  ;;  %v1822_v15 = vpop.f32.mrf.mxu0 }
 0x739   : > { %3028 = vpow2.f32 %v1652_v42  ;;  %v2880_v42 = vunpack.i.l.bf16 %v4407_v46 }
 0x73f   : > { %v4443_v11 = vpop.eup %3028  ;;  %v1825_v13 = vpop.f32.mrf.mxu0 }
 0x740   : > { %1656 = vadd.xlane.f32.xlu2 %v4443_v11 }
 0x744   : > { %1830 = vmax.xlane.f32.xlu1 %v1825_v13 }
 0x747   : > { %2858 = vrot.lane.b32.xlu0 %v3804_v9, %s3336_s22  ;;  %v1648_v9 = vsub.f32 %v4369_v10, %v1645_v40  ;;  %v4468_v10 = vpop.permute.xlu2 %2898 }
 0x748   : > { %1828 = vmax.xlane.f32.xlu2 %v1822_v15 }
 0x749   : > { %v1650_v48 = vmul.f32 1.442695, %v1648_v9 }
 0x74b   : > { %3030 = vpow2.f32 %v1650_v48  ;;  %v2901_v48 = vunpack.i.h.bf16 %v4468_v10 }
 0x74c   : > { %v2854_v57 = vpop.permute.xlu1 %2853 }
 0x74d   : > { %v2855_v35 = vunpack.i.l.bf16 %v2854_v57  ;;  %v2856_v32 = vunpack.i.h.bf16 %v2854_v57 }
 0x74f   : > { %1712 = vmatpush.msra.mxu2 %v2855_v35  ;;  %2873 = vrot.lane.b32.xlu0 %v3845_v25, %s3337_s3  ;;  %v2909_v30 = vpop.permute.xlu2 %2908 }
 0x750   : > { %v2911_v40 = vunpack.i.h.bf16 %v2909_v30 }
 0x751   : > { %1713 = vmatpush.msra.mxu2 %v2856_v32  ;;  %v4459_v39 = vpop.eup %3030  ;;  %v2910_v32 = vunpack.i.l.bf16 %v2909_v30 }
 0x754   : > { %v2869_v63 = vpop.permute.xlu1 %2868 }
 0x755   : > { %v2870_v55 = vunpack.i.l.bf16 %v2869_v63  ;;  %v2871_v19 = vunpack.i.h.bf16 %v2869_v63 }
 0x75c   : > { %v4450_v43 = vpop.permute.xlu1 %2883 }
 0x75d   : > { %v2885_v9 = vunpack.i.l.bf16 %v4450_v43 }
 0x760   : > { %2943 = vrot.lane.b32.xlu2 %v3936_v12, %s3337_s3 }
 0x764   : > { %v4454_v24 = vpop.permute.xlu1 %2893 }
 0x76c   : > { %v2904_v37 = vpop.permute.xlu1 %2903 }
 0x76d   : > { %v2905_v29 = vunpack.i.l.bf16 %v2904_v37  ;;  %v2906_v0 = vunpack.i.h.bf16 %v2904_v37  ;;  %v2886_v37 = vunpack.i.h.bf16 %v4450_v43 }
 0x76f   : > { %2080 = vmatpush.msrb.mxu1 %v2905_v29  ;;  %v2900_v29 = vunpack.i.l.bf16 %v4468_v10 }
 0x771   : > { %2081 = vmatpush.msrb.mxu1 %v2906_v0 }
 0x774   : > { %v4457_v25 = vpop.permute.xlu1 %2913 }
 0x775   : > { %v2915_v0 = vunpack.i.l.bf16 %v4457_v25 }
 0x779   : > { %1654 = vadd.xlane.f32.xlu0 %v4459_v39 }
 0x77c   : > { %v2919_v44 = vpop.permute.xlu1 %2918 }
 0x77d   : > { %v2920_v17 = vunpack.i.l.bf16 %v2919_v44  ;;  %v2921_v5 = vunpack.i.h.bf16 %v2919_v44  ;;  %v2916_v44 = vunpack.i.h.bf16 %v4457_v25 }
 0x77f   : > { %2082 = vmatpush.msrb.mxu1 %v2920_v17 }
 0x781   : > { %2083 = vmatpush.msrb.mxu1 %v2921_v5 }
 0x784   : > { %v4470_v8 = vpop.permute.xlu1 %2923 }
 0x785   : > { %v2925_v43 = vunpack.i.l.bf16 %v4470_v8  ;;  %v2926_v17 = vunpack.i.h.bf16 %v4470_v8 }
 0x78c   : > { %v4474_v27 = vpop.permute.xlu1 %2933 }
 0x78d   : > { %2928 = vrot.lane.b32.xlu0 %v3820_v23, %s3338_s23  ;;  %v2935_v5 = vunpack.i.l.bf16 %v4474_v27  ;;  %v2936_v58 = vunpack.i.h.bf16 %v4474_v27 }
 0x795   : > { %2938 = vrot.lane.b32.xlu0 %v3920_v22, %s3338_s23 }
 0x79d   : > { %2948 = vrot.lane.b32.xlu0 %v3853_v45, %s3338_s23 }
 0x79e   : > { %v2013_v52 = vpop.xlane.xlu0 %2012 }
 0x79f   : > { %v2016_v50 = vsub.f32 %v4437_v56, %v2013_v52 }
 0x7a1   : > { %v2018_v21 = vmul.f32 1.442695, %v2016_v50 }
 0x7a5   : > { %2953 = vrot.lane.b32.xlu0 %v3956_v28, %s3337_s3 }
 0x7a6   : > { %v2015_v51 = vpop.xlane.xlu0 %2014 }
 0x7a7   : > { %v2017_v56 = vsub.f32 %v4440_v47, %v2015_v51 }
 0x7a9   : > { %v2020_v57 = vmul.f32 1.442695, %v2017_v56 }
 0x7b3   : > { %v4476_v6 = vpop.xlane.xlu2 %1656 }
 0x7b7   : > { %v1831_v23 = vpop.xlane.xlu1 %1830 }
 0x7b8   : > { %v1833_v36 = vsub.f32 %v1825_v13, %v1831_v23  ;;  %v2896_v13 = vunpack.i.h.bf16 %v4454_v24 }
 0x7b9   : > { %v2859_v22 = vpop.permute.xlu0 %2858 }
 0x7ba   : > { %v1836_v31 = vmul.f32 1.442695, %v1833_v36  ;;  %v2860_v33 = vunpack.i.l.bf16 %v2859_v22  ;;  %v2861_v61 = vunpack.i.h.bf16 %v2859_v22 }
 0x7bb   : > { %v1829_v45 = vpop.xlane.xlu2 %1828 }
 0x7bc   : > { %3032 = vpow2.f32 %v1836_v31  ;;  %v1832_v18 = vsub.f32 %v1822_v15, %v1829_v45  ;;  %1714 = vmatpush.msra.mxu2 %v2860_v33  ;;  %v2895_v15 = vunpack.i.l.bf16 %v4454_v24 }
 0x7be   : > { %v1834_v38 = vmul.f32 1.442695, %v1832_v18  ;;  %1715 = vmatpush.msra.mxu2 %v2861_v61 }
 0x7c0   : > { %3034 = vpow2.f32 %v1834_v38  ;;  %1716 = vmatpush.msra.mxu2 %v2865_v3 }
 0x7c1   : > { %3036 = vpow2.f32 %v2018_v21  ;;  %v2874_v63 = vpop.permute.xlu0 %2873 }
 0x7c2   : > { %v4481_v53 = vpop.eup %3032  ;;  %1717 = vmatpush.msra.mxu2 %v2866_v7  ;;  %3038 = vpow2.f32 %v2020_v57  ;;  %v2875_v46 = vunpack.i.l.bf16 %v2874_v63  ;;  %v2876_v47 = vunpack.i.h.bf16 %v2874_v63  ;;  %v512_v57 = vld [vmem:[#allocation11 + $0x70] sm:$0xff]  ;;  %v509_v63 = vld [vmem:[#allocation11 + $0x58] sm:$0xff] }
 0x7c3   : > { %1840 = vadd.xlane.f32.xlu2 %v4481_v53  ;;  %v2944_v41 = vpop.permute.xlu2 %2943 }
 0x7c4   : > { %1718 = vmatpush.msra.mxu2 %v2870_v55  ;;  %v2946_v25 = vunpack.i.h.bf16 %v2944_v41 }
 0x7c6   : > { %v4484_v1 = vpop.eup %3034  ;;  %1719 = vmatpush.msra.mxu2 %v2871_v19 }
 0x7c7   : > { %1838 = vadd.xlane.f32.xlu1 %v4484_v1  ;;  %v4492_v35 = vpop.eup %3036 }
 0x7c8   : > { %1720 = vmatpush.msra.mxu2 %v2880_v42  ;;  %v4496_v24 = vpop.eup %3038 }
 0x7ca   : > { %1721 = vmatpush.msra.mxu2 %v2881_v62 }
 0x7cc   : > { %1722 = vmatpush.msra.mxu2 %v2895_v15 }
 0x7ce   : > { %1723 = vmatpush.msra.mxu2 %v2896_v13  ;;  %v513_v13 = vld [vmem:[#allocation11 + $0x78] sm:$0xff] }
 0x7cf   : > { %2022 = vadd.xlane.f32.xlu0 %v4492_v35 }
 0x7d0   : > { %1724 = vmatpush.msra.mxu2 %v2910_v32  ;;  %v510_v32 = vld [vmem:[#allocation11 + $0x60] sm:$0xff] }
 0x7d2   : > { %1725 = vmatpush.msra.mxu2 %v2911_v40 }
 0x7d4   : > { %1894 = vmatpush.msrb.mxu2 %v2875_v46  ;;  %v508_v46 = vld [vmem:[#allocation11 + $0x50] sm:$0xff] }
 0x7d6   : > { %1895 = vmatpush.msrb.mxu2 %v2876_v47  ;;  %v507_v47 = vld [vmem:[#allocation11 + $0x48] sm:$0xff] }
 0x7d7   : > { %2024 = vadd.xlane.f32.xlu0 %v4496_v24 }
 0x7d8   : > { %1896 = vmatpush.msrb.mxu2 %v2885_v9  ;;  %v506_v9 = vld [vmem:[#allocation11 + $0x40] sm:$0xff] }
 0x7da   : > { %1897 = vmatpush.msrb.mxu2 %v2886_v37 }
 0x7db   : > { %2973 = vrot.lane.b32.xlu2 %v2972_v20, %s3337_s3  ;;  %v2977_v20 = vpack.i.bf16 %v4427_v34, %v4423_v59 }
 0x7dc   : > { %1898 = vmatpush.msrb.mxu2 %v2900_v29  ;;  %v504_v29 = vld [vmem:[#allocation11 + $0x30] sm:$0xff] }
 0x7de   : > { %1899 = vmatpush.msrb.mxu2 %v2901_v48  ;;  %v503_v48 = vld [vmem:[#allocation11 + $0x28] sm:$0xff] }
 0x7e0   : > { %1900 = vmatpush.msrb.mxu2 %v2915_v0  ;;  %2958 = vrot.lane.b32.xlu1 %v3936_v12, %s3338_s23  ;;  %v2945_v12 = vunpack.i.l.bf16 %v2944_v41  ;;  %v502_v0 = vld [vmem:[#allocation11 + $0x20] sm:$0xff] }
 0x7e2   : > { %1901 = vmatpush.msrb.mxu2 %v2916_v44  ;;  %v501_v44 = vld [vmem:[#allocation11 + $0x18] sm:$0xff] }
 0x7e4   : > { %1902 = vmatpush.msrb.mxu2 %v2925_v43  ;;  %v500_v43 = vld [vmem:[#allocation11 + $0x10] sm:$0xff] }
 0x7e6   : > { %1903 = vmatpush.msrb.mxu2 %v2926_v17  ;;  %v499_v17 = vld [vmem:[#allocation11 + $0x8] sm:$0xff] }
 0x7e8   : > { %1904 = vmatpush.msrb.mxu2 %v2935_v5  ;;  %2963 = vrot.lane.b32.xlu1 %v3956_v28, %s3338_s23  ;;  %v498_v5 = vld [vmem:[#allocation11] sm:$0xff] }
 0x7ea   : > { %1905 = vmatpush.msrb.mxu2 %v2936_v58 }
 0x7eb   : > { %2978 = vrot.lane.b32.xlu0 %v2977_v20, %s3336_s22 }
 0x7ec   : > { %1906 = vmatpush.msrb.mxu2 %v2945_v12  ;;  %v1655_v10 = vpop.xlane.xlu0 %1654 }
 0x7ed   : > { %3040 = vrcp.f32 %v1655_v10 }
 0x7ee   : > { %1907 = vmatpush.msrb.mxu2 %v2946_v25  ;;  %3042 = vrcp.f32 %v4476_v6 }
 0x7f0   : > { %2968 = vrot.lane.b32.xlu1 %v2967_v26, %s3338_s23 }
 0x7f3   : > { %v3041_v8 = vpop.eup %3040 }
 0x7f4   : > { %v1660_v28 = vmul.f32 %v3041_v8, %v4459_v39  ;;  %v3043_v59 = vpop.eup %3042 }
 0x7f5   : > { %v1661_v34 = vmul.f32 %v3043_v59, %v4443_v11 }
 0x7f6   : > { %1726 = vmatmul.f32.vlgmr.msra.gmra.mxu2 %v1660_v28 }
 0x7f8   : > { %2983 = vrot.lane.b32.xlu1 %v2982_v2, %s3335_s25 }
 0x7fe   : > { %1729 = vmatmul.f32.gmra.mxu2 %v1661_v34 }
 0x7ff   : > { %v2929_v52 = vpop.permute.xlu0 %2928 }
 0x800   : > { %v2930_v30 = vunpack.i.l.bf16 %v2929_v52  ;;  %v2931_v27 = vunpack.i.h.bf16 %v2929_v52 }
 0x802   : > { %2084 = vmatpush.msrb.mxu1 %v2930_v30 }
 0x804   : > { %2085 = vmatpush.msrb.mxu1 %v2931_v27 }
 0x807   : > { %v2939_v49 = vpop.permute.xlu0 %2938 }
 0x808   : > { %v2940_v16 = vunpack.i.l.bf16 %v2939_v49  ;;  %v2941_v26 = vunpack.i.h.bf16 %v2939_v49 }
 0x80a   : > { %2086 = vmatpush.msrb.mxu1 %v2940_v16 }
 0x80c   : > { %2087 = vmatpush.msrb.mxu1 %v2941_v26 }
 0x80f   : > { %v2949_v39 = vpop.permute.xlu0 %2948 }
 0x810   : > { %v2950_v51 = vunpack.i.l.bf16 %v2949_v39  ;;  %v2951_v6 = vunpack.i.h.bf16 %v2949_v39 }
 0x812   : > { %2088 = vmatpush.msrb.mxu1 %v2950_v51 }
 0x814   : > { %2089 = vmatpush.msrb.mxu1 %v2951_v6 }
 0x817   : > { %v2954_v14 = vpop.permute.xlu0 %2953 }
 0x818   : > { %v2955_v4 = vunpack.i.l.bf16 %v2954_v14  ;;  %v2956_v2 = vunpack.i.h.bf16 %v2954_v14 }
 0x81a   : > { %1908 = vmatpush.msrb.mxu2 %v2955_v4 }
 0x81c   : > { %1909 = vmatpush.msrb.mxu2 %v2956_v2 }
 0x81e   : > { %2178 = vmatpush.msra.mxu2 %v513_v13 }
 0x820   : > { %2179 = vmatpush.msra.mxu2 %v512_v57 }
 0x836   : > { %v1841_v23 = vpop.xlane.xlu2 %1840 }
 0x83a   : > { %v1839_v11 = vpop.xlane.xlu1 %1838 }
 0x83b   : > { %3044 = vrcp.f32 %v1839_v11 }
 0x83c   : > { %3046 = vrcp.f32 %v1841_v23 }
 0x83e   : > { %v2974_v12 = vpop.permute.xlu2 %2973 }
 0x83f   : > { %v2975_v8 = vunpack.i.l.bf16 %v2974_v12  ;;  %v2976_v51 = vunpack.i.h.bf16 %v2974_v12 }
 0x841   : > { %v3045_v36 = vpop.eup %3044 }
 0x842   : > { %v1844_v22 = vmul.f32 %v3045_v36, %v4484_v1  ;;  %v3047_v31 = vpop.eup %3046  ;;  %v2023_v45 = vpop.xlane.xlu0 %2022 }
 0x843   : > { %v1845_v33 = vmul.f32 %v3047_v31, %v4481_v53  ;;  %3048 = vrcp.f32 %v2023_v45 }
 0x844   : > { %1910 = vmatmul.f32.vlgmr.msrb.gmra.mxu2 %v1844_v22 }
 0x849   : > { %v3049_v50 = vpop.eup %3048 }
 0x84a   : > { %v2025_v38 = vpop.xlane.xlu0 %2024  ;;  %v2028_v21 = vmul.f32 %v3049_v50, %v4492_v35  ;;  %v511_v35 = vld [vmem:[#allocation11 + $0x68] sm:$0xff] }
 0x84b   : > { %3050 = vrcp.f32 %v2025_v38  ;;  %2180 = vmatpush.msra.mxu2 %v511_v35  ;;  %v3058_v50 = vld [vmem:[%s3543_s18] sm:$0xff] }
 0x84c   : > { %1913 = vmatmul.f32.gmra.mxu2 %v1845_v33 }
 0x84d   : > { %2181 = vmatpush.msra.mxu2 %v510_v32 }
 0x84f   : > { %2182 = vmatpush.msra.mxu2 %v509_v63 }
 0x851   : > { %v3051_v53 = vpop.eup %3050  ;;  %2183 = vmatpush.msra.mxu2 %v508_v46 }
 0x852   : > { %v2959_v61 = vpop.permute.xlu1 %2958  ;;  %v2029_v1 = vmul.f32 %v3051_v53, %v4496_v24  ;;  %v505_v24 = vld [vmem:[#allocation11 + $0x38] sm:$0xff] }
 0x853   : > { %v2960_v18 = vunpack.i.l.bf16 %v2959_v61  ;;  %v2961_v3 = vunpack.i.h.bf16 %v2959_v61  ;;  %2184 = vmatpush.msra.mxu2 %v507_v47  ;;  %v3059_v53 = vld [vmem:[%s3543_s18 + $0x8] sm:$0xff] }
 0x855   : > { %2090 = vmatpush.msrb.mxu1 %v2960_v18  ;;  %2185 = vmatpush.msra.mxu2 %v506_v9  ;;  %v4559_v18 = vld [vmem:[%s4608_s7] sm:$0x7] }
 0x857   : > { %2091 = vmatpush.msrb.mxu1 %v2961_v3  ;;  %2186 = vmatpush.msra.mxu2 %v505_v24  ;;  %v2177_v3 = vperm.slane %v4559_v18, 0 }
 0x859   : > { %2187 = vmatpush.msra.mxu2 %v504_v29 }
 0x85a   : > { %v2964_v7 = vpop.permute.xlu1 %2963 }
 0x85b   : > { %v2965_v55 = vunpack.i.l.bf16 %v2964_v7  ;;  %v2966_v19 = vunpack.i.h.bf16 %v2964_v7  ;;  %2188 = vmatpush.msra.mxu2 %v503_v48 }
 0x85d   : > { %2092 = vmatpush.msrb.mxu1 %v2965_v55  ;;  %2189 = vmatpush.msra.mxu2 %v502_v0  ;;  %v2979_v28 = vpop.permute.xlu0 %2978 }
 0x85e   : > { %v2980_v52 = vunpack.i.l.bf16 %v2979_v28  ;;  %v2981_v11 = vunpack.i.h.bf16 %v2979_v28  ;;  %v2250_v28 = vperm.slane %v4559_v18, 1 }
 0x85f   : > { %2093 = vmatpush.msrb.mxu1 %v2966_v19  ;;  %2190 = vmatpush.msra.mxu2 %v501_v44 }
 0x860   : > { %2094 = vmatmul.f32.vlgmr.msrb.gmra.mxu1 %v2028_v21 }
 0x861   : > { %2191 = vmatpush.msra.mxu2 %v500_v43 }
 0x862   : > { %v2969_v41 = vpop.permute.xlu1 %2968 }
 0x863   : > { %2192 = vmatpush.msra.mxu2 %v499_v17  ;;  %v2970_v20 = vunpack.i.l.bf16 %v2969_v41  ;;  %v2971_v30 = vunpack.i.h.bf16 %v2969_v41 }
 0x865   : > { %2193 = vmatpush.msra.mxu2 %v498_v5  ;;  %v2157_v25 = vsel %vm678_vm0, %v4040_v54, %v2970_v20  ;;  %v2158_v54 = vsel %vm678_vm0, %v4044_v60, %v2971_v30 }
 0x866   : > { %v2160_v34 = vsel %vm2159_vm1, %v2157_v25, %v2975_v8  ;;  %v2161_v2 = vsel %vm2159_vm1, %v2158_v54, %v2976_v51 }
 0x867   : > { %v2163_v27 = vsel %vm2162_vm2, %v2160_v34, %v2980_v52  ;;  %v2164_v36 = vsel %vm2162_vm2, %v2161_v2, %v2981_v11  ;;  %v2253_v52 = vperm.slane %v4559_v18, 2 }
 0x868   : > { %2097 = vmatmul.f32.gmra.mxu1 %v2029_v1 }
 0x86a   : > { %v2984_v58 = vpop.permute.xlu1 %2983 }
 0x86b   : > { %v2985_v59 = vunpack.i.l.bf16 %v2984_v58  ;;  %v2986_v4 = vunpack.i.h.bf16 %v2984_v58 }
 0x86d   : > { %v2166_v49 = vsel %vm2165_vm3, %v2163_v27, %v2985_v59  ;;  %v2167_v22 = vsel %vm2165_vm3, %v2164_v36, %v2986_v4 }
 0x879   : > { %v1727_v42 = vpop.f32.mrf.mxu2 }
 0x87a   : > { %2135 = vrot.lane.b32.xlu1 %v1727_v42, %s3334_s6  ;;  %v3339_v42 = vmov 128.0  }
 0x87b   : > { %3052 = vrcp.f32 %v3339_v42 }
 0x881   : > { %v1730_v62 = vpop.f32.mrf.mxu2 }
 0x882   : > { %2137 = vrot.lane.b32.xlu0 %v1730_v62, %s3334_s6  ;;  %v3053_v62 = vpop.eup %3052 }
 0x883   : > { %vm2212_vm7 = vweird.f32 %v3053_v62 }
 0x8c7   : > { %v1911_v56 = vpop.f32.mrf.mxu2 }
 0x8c8   : > { %2143 = vrot.lane.b32.xlu1 %v1911_v56, %s3333_s4  ;;  %v2208_v56 = vmul.f32 128.0, %v3053_v62 }
 0x8cf   : > { %v1914_v15 = vpop.f32.mrf.mxu2 }
 0x8d0   : > { %2145 = vrot.lane.b32.xlu1 %v1914_v15, %s3333_s4  ;;  %v2209_v15 = vsub.f32 1.0, %v2208_v56  ;;  %s3260_s4 = scalar_lea.hbm %s4609_s8, 32 }
 0x8d1   : > { %p3262_p10 = scmp.lt.s32.totalorder %s3260_s4, %s3256_s21 }
 0x8d2   : > { %v2210_v13 = vmul.f32 %v3053_v62, %v2209_v15 }
 0x8d3   : > { %p3263_p11 = por %p3262_p10, %p3261_p2 }
 0x8d4   : > { %v2211_v57 = vadd.f32 %v3053_v62, %v2210_v13 }
 0x8d5   : > { %p3264_p9 = pnand %p3263_p11, %p3259_p8 }
 0x8d6   : > { %v2213_v35 = vsel %vm2212_vm7, %v3053_v62, %v2211_v57 }
 0x8dd   : > { %v2095_v40 = vpop.f32.mrf.mxu1 }
 0x8de   : > { %2151 = vrot.lane.b32.xlu2 %v2095_v40, %s3332_s10 }
 0x8e5   : > { %v2098_v37 = vpop.f32.mrf.mxu1 }
 0x8e6   : > { %2153 = vrot.lane.b32.xlu2 %v2098_v37, %s3332_s10 }
 0x8ec   : > { %v2136_v10 = vpop.permute.xlu1 %2135 }
 0x8ed   : > { %v2169_v26 = vsel %vm2168_vm4, %v2166_v49, %v2136_v10 }
 0x8f4   : > { %v2138_v23 = vpop.permute.xlu0 %2137 }
 0x8f5   : > { %v2170_v60 = vsel %vm2168_vm4, %v2167_v22, %v2138_v23 }
 0x938   : > { %v2152_v16 = vpop.permute.xlu2 %2151 }
 0x93a   : > { %v2144_v39 = vpop.permute.xlu1 %2143 }
 0x93b   : > { %v2172_v6 = vsel %vm2171_vm5, %v2169_v26, %v2144_v39 }
 0x93c   : > { %v2175_v14 = vsel %vm2174_vm6, %v2172_v6, %v2152_v16 }
 0x93d   : > { %2194 = vmatmul.f32.vlgmr.msra.gmra.mxu2 %v2175_v14 }
 0x940   : > { %v2154_v33 = vpop.permute.xlu2 %2153 }
 0x942   : > { %v2146_v31 = vpop.permute.xlu1 %2145 }
 0x943   : > { %v2173_v45 = vsel %vm2171_vm5, %v2170_v60, %v2146_v31 }
 0x944   : > { %v2176_v61 = vsel %vm2174_vm6, %v2173_v45, %v2154_v33 }
 0x945   : > { %2197 = vmatmul.f32.gmra.mxu2 %v2176_v61 }
 0x9c0   : > { %v2195_v38 = vpop.f32.mrf.mxu2 }
 0x9c1   : > { %v2196_v7 = vadd.f32 %v2195_v38, %v2177_v3 }
 0x9c3   : > { %v2201_v55 = vadd.f32 %v3058_v50, %v2196_v7 }
 0x9c5   : > { %2203 = vadd.xlane.f32.xlu0 %v2201_v55 }
 0x9c8   : > { %v2198_v19 = vpop.f32.mrf.mxu2 }
 0x9c9   : > { %v2199_v21 = vadd.f32 %v2198_v19, %v2177_v3 }
 0x9cb   : > { %v2202_v1 = vadd.f32 %v3059_v53, %v2199_v21 }
 0x9cd   : > { %2205 = vadd.xlane.f32.xlu1 %v2202_v1 }
 0xa38   : > { %v2204_v32 = vpop.xlane.xlu0 %2203 }
 0xa39   : > { %v2214_v63 = vmul.f32 %v2213_v35, %v2204_v32 }
 0xa3b   : > { %v2216_v40 = vsub.f32 %v2201_v55, %v2214_v63 }
 0xa3d   : > { %v2218_v46 = vmul.f32 %v2216_v40, %v2216_v40 }
 0xa3f   : > { %2220 = vadd.xlane.f32.xlu2 %v2218_v46 }
 0xa40   : > { %v2206_v47 = vpop.xlane.xlu1 %2205 }
 0xa41   : > { %v2215_v9 = vmul.f32 %v2213_v35, %v2206_v47 }
 0xa43   : > { %v2217_v24 = vsub.f32 %v2202_v1, %v2215_v9 }
 0xa45   : > { %v2219_v37 = vmul.f32 %v2217_v24, %v2217_v24 }
 0xa47   : > { %2222 = vadd.xlane.f32.xlu0 %v2219_v37 }
 0xab2   : > { %v2221_v29 = vpop.xlane.xlu2 %2220 }
 0xab3   : > { %v2224_v48 = vmul.f32 %v2221_v29, %v2213_v35 }
 0xab5   : > { %v2226_v0 = vadd.f32 1e-05, %v2224_v48 }
 0xab7   : > { %3054 = vrsqrt.f32 %v2226_v0  ;;  %vm2234_vm9 = vweird.f32 %v2226_v0 }
 0xaba   : > { %v2223_v44 = vpop.xlane.xlu0 %2222 }
 0xabb   : > { %v2225_v43 = vmul.f32 %v2223_v44, %v2213_v35 }
 0xabd   : > { %v3055_v17 = vpop.eup %3054  ;;  %v2227_v5 = vadd.f32 1e-05, %v2225_v43 }
 0xabe   : > { %v2229_v41 = vmul.f32 %v3055_v17, %v2226_v0  ;;  %vm2235_vm8 = vweird.f32 %v3055_v17 }
 0xabf   : > { %3056 = vrsqrt.f32 %v2227_v5  ;;  %vm2236_vm10 = vmor %vm2234_vm9, %vm2235_vm8  ;;  %vm2244_vm12 = vweird.f32 %v2227_v5 }
 0xac0   : > { %v2230_v58 = vmul.f32 %v3055_v17, %v2229_v41 }
 0xac2   : > { %v2231_v20 = vmul.f32 0.5, %v2230_v58 }
 0xac4   : > { %v2232_v12 = vsub.f32 1.5, %v2231_v20 }
 0xac5   : > { %v3057_v25 = vpop.eup %3056 }
 0xac6   : > { %v2233_v10 = vmul.f32 %v3055_v17, %v2232_v12  ;;  %v2239_v8 = vmul.f32 %v3057_v25, %v2227_v5  ;;  %vm2245_vm11 = vweird.f32 %v3057_v25 }
 0xac7   : > { %vm2246_vm13 = vmor %vm2244_vm12, %vm2245_vm11 }
 0xac8   : > { %v2237_v59 = vsel %vm2236_vm10, %v3055_v17, %v2233_v10  ;;  %v2240_v34 = vmul.f32 %v3057_v25, %v2239_v8 }
 0xac9   : > { %v2248_v30 = vmul.f32 %v2237_v59, %v2216_v40 }
 0xaca   : > { %v2241_v27 = vmul.f32 0.5, %v2240_v34 }
 0xacb   : > { %v2251_v49 = vmul.f32 %v2250_v28, %v2248_v30 }
 0xacc   : > { %v2242_v16 = vsub.f32 1.5, %v2241_v27 }
 0xacd   : > { %v2254_v54 = vadd.f32 %v2253_v52, %v2251_v49 }
 0xace   : > { %v2243_v26 = vmul.f32 %v3057_v25, %v2242_v16 }
 0xacf   : > { %2256 = vst [vmem:[%s431_s17] sm:$0xff] %v2254_v54 }
 0xad0   : > { %v2247_v39 = vsel %vm2246_vm13, %v3057_v25, %v2243_v26 }
 0xad1   : > { %v2249_v51 = vmul.f32 %v2247_v39, %v2217_v24 }
 0xad3   : > { %v2252_v6 = vmul.f32 %v2250_v28, %v2249_v51 }
 0xad5   : > { %v2255_v14 = vadd.f32 %v2253_v52, %v2252_v6 }
 0xad7   : > { %2257 = vst [vmem:[%s431_s17 + $0x8] sm:$0xff] %v2255_v14 }
 0xad8   : > { %3267 = shalt.err (!%p3264_p9)
}
 0xad9   : > { %s3340_s2 = smov 128   ;;  %s3341_s22 = smov 8  }
 0xada   : > { %2601 = dma.vmem_to_hbm [thread:$0]  (%p3477_p3), %s2272_s20, 256, %s2274_s26, %s2259_s9, %s3340_s2, %s3340_s2, %s3341_s22  }
 0xadb PF: > { %s2288_s3 = sand.u32 1, %s3310_s27   ;;  %p4636_p12 = scmp.ge.s32.totalorder %s3322_s30, 2 }
 0xadc   : > { %s2289_s23 = scalar_lea.sflag [#allocation4], %s2288_s3 }
 0xadd   : > { %p2624_p13 = pnand %p4636_p12, %p3422_p6 }
 0xadf   : > { %p2625_p0 = pneg %p2624_p13 }
 0xae1   : > { %3305 = dma.done.wait (%p2625_p0), %s2289_s23, 256  }
 0xae2   : > { %3307 = vsyncadd (%p2625_p0), %s2289_s23, 4294967040  ;;  %s4637_s30 = sld [smem:[#allocation21_spill]]  ;;  %s4640_s27 = smov %s3314_s28 }
 0xae3   : > { %s4638_s15 = sld [smem:[#allocation20_spill]] }
 0xae4   : > { %s4639_s29 = sld [smem:[#allocation22_spill]] }
 0xae8   : > { %p26_p5 = scmp.ge.s32.totalorder %s4637_s30, 4  }
 0xae9   : > { %s4641_s28 = smov %s4638_s15 }
 0xaea   :  { %28 = sbr.rel (!%p26_p5) target bundleno = 14 (0xe), region = 126 }
 0xaef   :  { %2295 = vsyncpa [#allocation3], 1 }
 0xaf0   :  { %2297 = vsyncpa [#allocation3 + $0x1], 1 }
 0xaf1   :  { %2298 = vsyncpa [#allocation6], 1 }
 0xaf2   :  { %2300 = vsyncpa [#allocation6 + $0x1], 1 }
 0xaf3   :  { %2301 = vsyncpa [#allocation9], 1 }
 0xaf4   :  { %2302 = vsyncpa [#allocation12], 1 }
 0xaf5   :  { %2303 = vsyncpa [#allocation4], 1 }
 0xaf6   :  { %2305 = vsyncpa [#allocation4 + $0x1], 1 }

</bundles_post_ra>
